<compile_context>
chip_gen: v6e
topology: v6e:2x2x1
jax: 0.10.0
libtpu: 0.0.40
codegen_flags: <defaults>
</compile_context>

<pallas_src>
import functools

import jax
import jax.numpy as jnp
from jax.experimental import pallas as pl
from jax.experimental.pallas import tpu as pltpu


# --------------------------------------------------------------------------- #
# Kernel: one batch element per grid step (everything per-row is (1, X)).
# --------------------------------------------------------------------------- #
def _decoder_kernel(s_len,
                    emb_ref, hid_ref, enc_ref,
                    wah_ref, wae_ref, ab_ref, v_ref,
                    wxr_e_ref, wxr_c_ref, wxz_e_ref, wxz_c_ref,
                    wxn_e_ref, wxn_c_ref,
                    whr_ref, whz_ref, whn_ref,
                    br_ref, bz_ref, bin_ref, bhn_ref,
                    woh_ref, woc_ref, bo_ref,
                    pred_ref, hnew_ref, attn_ref):
    emb = emb_ref[0]                      # (1, E)
    h = hid_ref[0]                        # (1, H)
    enc = enc_ref[...]                    # (S_pad, 2H)  lane-dense rows

    # ---------------- attention ----------------
    # Linear over cat([hidden, enc]) split into two matmuls on pre-transposed weights.
    h_proj = jnp.dot(h, wah_ref[...], preferred_element_type=jnp.float32) + ab_ref[...]   # (1, H)
    e_proj = jnp.dot(enc, wae_ref[...], preferred_element_type=jnp.float32)               # (S_pad, H)
    energy = jnp.tanh(e_proj + h_proj)                                                    # (S_pad, H)

    # v . energy  -> lane-dense (1, S_pad) row of scores (contract over H).
    scores = jax.lax.dot_general(
        v_ref[...], energy,
        dimension_numbers=(((1,), (1,)), ((), ())),
        preferred_element_type=jnp.float32)                                               # (1, S_pad)

    # mask padded src positions, softmax over src_len
    col = jax.lax.broadcasted_iota(jnp.int32, scores.shape, 1)
    scores = jnp.where(col < s_len, scores, -1e30)
    m = jnp.max(scores, axis=-1, keepdims=True)
    e = jnp.exp(scores - m)
    denom = jnp.sum(e, axis=-1, keepdims=True)
    p = e * pl.reciprocal(denom, approx=True)                                             # (1, S_pad)
    attn_ref[0] = p

    # context = attn @ enc   (padded positions contribute exactly 0)
    ctx = jnp.dot(p, enc, preferred_element_type=jnp.float32)                             # (1, 2H)

    # ---------------- GRU cell (single step, PyTorch gate order r, z, n) ----------------
    r = jax.nn.sigmoid(
        jnp.dot(emb, wxr_e_ref[...], preferred_element_type=jnp.float32)
        + jnp.dot(ctx, wxr_c_ref[...], preferred_element_type=jnp.float32)
        + jnp.dot(h, whr_ref[...], preferred_element_type=jnp.float32)
        + br_ref[...])
    z = jax.nn.sigmoid(
        jnp.dot(emb, wxz_e_ref[...], preferred_element_type=jnp.float32)
        + jnp.dot(ctx, wxz_c_ref[...], preferred_element_type=jnp.float32)
        + jnp.dot(h, whz_ref[...], preferred_element_type=jnp.float32)
        + bz_ref[...])
    n = jnp.tanh(
        jnp.dot(emb, wxn_e_ref[...], preferred_element_type=jnp.float32)
        + jnp.dot(ctx, wxn_c_ref[...], preferred_element_type=jnp.float32)
        + bin_ref[...]
        + r * (jnp.dot(h, whn_ref[...], preferred_element_type=jnp.float32) + bhn_ref[...]))
    h_new = (1.0 - z) * n + z * h
    hnew_ref[0] = h_new

    # ---------------- fc_out over cat([output, context]) ----------------
    pred = (jnp.dot(h_new, woh_ref[...], preferred_element_type=jnp.float32)
            + jnp.dot(ctx, woc_ref[...], preferred_element_type=jnp.float32)
            + bo_ref[...])
    pred_ref[0] = pred


# --------------------------------------------------------------------------- #
# Wrapper: layout glue (gather, padding, weight splits / pre-transposes).
# --------------------------------------------------------------------------- #
def decoder_forward(input_token, hidden, encoder_outputs, params):
    B, S, H2 = encoder_outputs.shape
    H = hidden.shape[-1]
    E = params["emb_table"].shape[1]
    O = params["fc_w"].shape[0]
    S_pad = max(128, ((S + 127) // 128) * 128)

    # TODO(synk): embedding gather stays in the XLA wrapper; an in-kernel gather would
    #             need a scalar-prefetch Element index_map and is overkill for (B, E).
    emb3 = jnp.take(params["emb_table"], input_token, axis=0).reshape(B, 1, E)
    hid3 = jnp.transpose(hidden, (1, 0, 2))                       # (B, 1, H)

    enc_pad = jnp.pad(encoder_outputs, ((0, 0), (0, S_pad - S), (0, 0)))
    enc2d = enc_pad.reshape(B * S_pad, H2)                        # lane-dense rows for the MXU

    # attention Linear(3H, H): split the concat halves, pre-transpose.
    aw = params["attn_w"]
    wahT = aw[:, :H].T                                            # (H, H)
    waeT = aw[:, H:].T                                            # (2H, H)
    ab = params["attn_b"].reshape(1, H)
    vv = params["v"].reshape(1, H)

    # GRU weights: PyTorch packs gates as [r, z, n]; rnn input = cat([emb, ctx]).
    w_ih, w_hh = params["w_ih"], params["w_hh"]
    b_ih, b_hh = params["b_ih"], params["b_hh"]
    wxr, wxz, wxn = w_ih[:H], w_ih[H:2 * H], w_ih[2 * H:]
    whr, whz, whn = w_hh[:H].T, w_hh[H:2 * H].T, w_hh[2 * H:].T
    wxr_e, wxr_c = wxr[:, :E].T, wxr[:, E:].T
    wxz_e, wxz_c = wxz[:, :E].T, wxz[:, E:].T
    wxn_e, wxn_c = wxn[:, :E].T, wxn[:, E:].T
    b_r = (b_ih[:H] + b_hh[:H]).reshape(1, H)
    b_z = (b_ih[H:2 * H] + b_hh[H:2 * H]).reshape(1, H)
    b_in = b_ih[2 * H:].reshape(1, H)
    b_hn = b_hh[2 * H:].reshape(1, H)

    # fc_out Linear(3H, O) over cat([output, context]): split + pre-transpose.
    fw = params["fc_w"]
    wohT = fw[:, :H].T                                            # (H, O)
    wocT = fw[:, H:].T                                            # (2H, O)
    bo = params["fc_b"].reshape(1, O)

    weights = (wahT, waeT, ab, vv,
               wxr_e, wxr_c, wxz_e, wxz_c, wxn_e, wxn_c,
               whr, whz, whn,
               b_r, b_z, b_in, b_hn,
               wohT, wocT, bo)

    def _full_spec(arr):                                          # broadcast weights (no re-DMA)
        return pl.BlockSpec(arr.shape, lambda i: (0, 0))

    in_specs = [
        pl.BlockSpec((1, 1, E), lambda i: (i, 0, 0)),             # embedded
        pl.BlockSpec((1, 1, H), lambda i: (i, 0, 0)),             # hidden
        pl.BlockSpec((S_pad, H2), lambda i: (i, 0)),              # encoder rows (per batch)
    ] + [_full_spec(w) for w in weights]

    out_specs = [
        pl.BlockSpec((1, 1, O), lambda i: (i, 0, 0)),             # prediction
        pl.BlockSpec((1, 1, H), lambda i: (i, 0, 0)),             # new hidden
        pl.BlockSpec((1, 1, S_pad), lambda i: (i, 0, 0)),         # attn weights (lane-dense)
    ]
    out_shape = [
        jax.ShapeDtypeStruct((B, 1, O), jnp.float32),
        jax.ShapeDtypeStruct((B, 1, H), jnp.float32),
        jax.ShapeDtypeStruct((B, 1, S_pad), jnp.float32),
    ]

    # VMEM budget: ~75% of the chip's physical VMEM (96 MiB on v5e/v6e, 48 MiB on v7x).
    try:
        vmem_cap = pltpu.get_tpu_info().vmem_capacity_bytes
    except Exception:
        vmem_cap = 64 * 1024 * 1024
    compiler_params = pltpu.CompilerParams(
        dimension_semantics=("parallel",),
        vmem_limit_bytes=int(vmem_cap * 0.75),
    )

    pred3, hnew3, attn3 = pl.pallas_call(
        functools.partial(_decoder_kernel, S),
        grid=(B,),
        in_specs=in_specs,
        out_specs=out_specs,
        out_shape=out_shape,
        compiler_params=compiler_params,
    )(emb3, hid3, enc2d, *weights)

    prediction = pred3[:, 0, :]                                   # (B, O)
    hidden_new = jnp.transpose(hnew3, (1, 0, 2))                  # (1, B, H)
    attn = attn3[:, 0, :S]                                        # (B, S)
    return prediction, hidden_new, attn


# --------------------------------------------------------------------------- #
# Pure-JAX reference mirroring the PyTorch Decoder.forward exactly.
# --------------------------------------------------------------------------- #
def decoder_ref(input_token, hidden, enc, params):
    emb = params["emb_table"][input_token]                        # (B, E)
    B, S, _ = enc.shape
    H = hidden.shape[-1]
    # attention
    h = jnp.transpose(hidden, (1, 0, 2))                          # (B, 1, H)
    hrep = jnp.repeat(h, S, axis=1)                               # (B, S, H)
    cat = jnp.concatenate([hrep, enc], axis=2)                    # (B, S, 3H)
    energy = jnp.tanh(cat @ params["attn_w"].T + params["attn_b"])
    scores = jnp.einsum("bsh,h->bs", energy, params["v"])
    attn = jax.nn.softmax(scores, axis=1)                         # (B, S)
    ctx = jnp.einsum("bs,bsk->bk", attn, enc)                     # (B, 2H)
    # single-step GRU (PyTorch gate order r, z, n)
    x = jnp.concatenate([emb, ctx], axis=1)                       # (B, E + 2H)
    h0 = hidden[0]
    gi = x @ params["w_ih"].T + params["b_ih"]
    gh = h0 @ params["w_hh"].T + params["b_hh"]
    r = jax.nn.sigmoid(gi[:, :H] + gh[:, :H])
    z = jax.nn.sigmoid(gi[:, H:2 * H] + gh[:, H:2 * H])
    n = jnp.tanh(gi[:, 2 * H:] + r * gh[:, 2 * H:])
    h_new = (1.0 - z) * n + z * h0
    pred = jnp.concatenate([h_new, ctx], axis=1) @ params["fc_w"].T + params["fc_b"]
    return pred, h_new[None], attn


if __name__ == "__main__":
    B, S, H, E, V, O = 2, 8, 32, 16, 16, 10
    key = jax.random.PRNGKey(0)
    ks = jax.random.split(key, 13)

    input_token = jax.random.randint(ks[0], (B,), 0, V)
    hidden = jax.random.normal(ks[1], (1, B, H), jnp.float32)
    encoder_outputs = jax.random.normal(ks[2], (B, S, 2 * H), jnp.float32)

    def u(k, shape, s=0.1):
        return jax.random.uniform(k, shape, jnp.float32, minval=-s, maxval=s)

    params = dict(
        emb_table=jax.random.normal(ks[3], (V, E), jnp.float32),
        attn_w=u(ks[4], (H, 3 * H)),
        attn_b=u(ks[5], (H,)),
        v=jax.random.uniform(ks[6], (H,), jnp.float32, minval=0.0, maxval=1.0),
        w_ih=u(ks[7], (3 * H, E + 2 * H)),
        w_hh=u(ks[8], (3 * H, H)),
        b_ih=u(ks[9], (3 * H,)),
        b_hh=u(ks[10], (3 * H,)),
        fc_w=u(ks[11], (O, 3 * H)),
        fc_b=u(ks[12], (O,)),
    )

    pred, hid_new, attn = decoder_forward(input_token, hidden, encoder_outputs, params)
    pred, hid_new, attn = jax.block_until_ready((pred, hid_new, attn))

    pred_r, hid_r, attn_r = decoder_ref(input_token, hidden, encoder_outputs, params)

    assert pred.shape == (B, O)
    assert hid_new.shape == (1, B, H)
    assert attn.shape == (B, S)
    # Tolerance accounts for the EUP approximate reciprocal used for the softmax
    # normalization and TPU matmul precision.
    assert jnp.allclose(attn, attn_r, atol=2e-2, rtol=2e-2), "attn mismatch"
    assert jnp.allclose(pred, pred_r, atol=2e-2, rtol=2e-2), "prediction mismatch"
    assert jnp.allclose(hid_new, hid_r, atol=2e-2, rtol=2e-2), "hidden mismatch"
    print("KERNEL_OK")
</pallas_src>

<mosaic_0001>
module attributes {stable_mosaic.version = 11 : i64} {
  func.func @_decoder_kernel(%arg0: i32, %arg1: memref<1x1x16xf32, #tpu.memory_space<vmem>>, %arg2: memref<1x1x32xf32, #tpu.memory_space<vmem>>, %arg3: memref<128x64xf32, #tpu.memory_space<vmem>>, %arg4: memref<32x32xf32, #tpu.memory_space<vmem>>, %arg5: memref<64x32xf32, #tpu.memory_space<vmem>>, %arg6: memref<1x32xf32, #tpu.memory_space<vmem>>, %arg7: memref<1x32xf32, #tpu.memory_space<vmem>>, %arg8: memref<16x32xf32, #tpu.memory_space<vmem>>, %arg9: memref<64x32xf32, #tpu.memory_space<vmem>>, %arg10: memref<16x32xf32, #tpu.memory_space<vmem>>, %arg11: memref<64x32xf32, #tpu.memory_space<vmem>>, %arg12: memref<16x32xf32, #tpu.memory_space<vmem>>, %arg13: memref<64x32xf32, #tpu.memory_space<vmem>>, %arg14: memref<32x32xf32, #tpu.memory_space<vmem>>, %arg15: memref<32x32xf32, #tpu.memory_space<vmem>>, %arg16: memref<32x32xf32, #tpu.memory_space<vmem>>, %arg17: memref<1x32xf32, #tpu.memory_space<vmem>>, %arg18: memref<1x32xf32, #tpu.memory_space<vmem>>, %arg19: memref<1x32xf32, #tpu.memory_space<vmem>>, %arg20: memref<1x32xf32, #tpu.memory_space<vmem>>, %arg21: memref<32x10xf32, #tpu.memory_space<vmem>>, %arg22: memref<64x10xf32, #tpu.memory_space<vmem>>, %arg23: memref<1x10xf32, #tpu.memory_space<vmem>>, %arg24: memref<1x1x10xf32, #tpu.memory_space<vmem>>, %arg25: memref<1x1x32xf32, #tpu.memory_space<vmem>>, %arg26: memref<1x1x128xf32, #tpu.memory_space<vmem>>) attributes {dimension_semantics = [#tpu.dimension_semantics<parallel>], iteration_bounds = array<i64: 2>, scalar_prefetch = 0 : i64, scratch_operands = 0 : i64, tpu.core_type = #tpu.core_type<tc>, window_params = [{transform_indices = @transform_0, window_bounds = array<i64: 1, 1, 16>}, {transform_indices = @transform_1, window_bounds = array<i64: 1, 1, 32>}, {transform_indices = @transform_2, window_bounds = array<i64: 128, 64>}, {pipeline_mode = #tpu.pipeline_mode<synchronous>, transform_indices = @transform_3, window_bounds = array<i64: 32, 32>}, {pipeline_mode = #tpu.pipeline_mode<synchronous>, transform_indices = @transform_4, window_bounds = array<i64: 64, 32>}, {pipeline_mode = #tpu.pipeline_mode<synchronous>, transform_indices = @transform_5, window_bounds = array<i64: 1, 32>}, {pipeline_mode = #tpu.pipeline_mode<synchronous>, transform_indices = @transform_6, window_bounds = array<i64: 1, 32>}, {pipeline_mode = #tpu.pipeline_mode<synchronous>, transform_indices = @transform_7, window_bounds = array<i64: 16, 32>}, {pipeline_mode = #tpu.pipeline_mode<synchronous>, transform_indices = @transform_8, window_bounds = array<i64: 64, 32>}, {pipeline_mode = #tpu.pipeline_mode<synchronous>, transform_indices = @transform_9, window_bounds = array<i64: 16, 32>}, {pipeline_mode = #tpu.pipeline_mode<synchronous>, transform_indices = @transform_10, window_bounds = array<i64: 64, 32>}, {pipeline_mode = #tpu.pipeline_mode<synchronous>, transform_indices = @transform_11, window_bounds = array<i64: 16, 32>}, {pipeline_mode = #tpu.pipeline_mode<synchronous>, transform_indices = @transform_12, window_bounds = array<i64: 64, 32>}, {pipeline_mode = #tpu.pipeline_mode<synchronous>, transform_indices = @transform_13, window_bounds = array<i64: 32, 32>}, {pipeline_mode = #tpu.pipeline_mode<synchronous>, transform_indices = @transform_14, window_bounds = array<i64: 32, 32>}, {pipeline_mode = #tpu.pipeline_mode<synchronous>, transform_indices = @transform_15, window_bounds = array<i64: 32, 32>}, {pipeline_mode = #tpu.pipeline_mode<synchronous>, transform_indices = @transform_16, window_bounds = array<i64: 1, 32>}, {pipeline_mode = #tpu.pipeline_mode<synchronous>, transform_indices = @transform_17, window_bounds = array<i64: 1, 32>}, {pipeline_mode = #tpu.pipeline_mode<synchronous>, transform_indices = @transform_18, window_bounds = array<i64: 1, 32>}, {pipeline_mode = #tpu.pipeline_mode<synchronous>, transform_indices = @transform_19, window_bounds = array<i64: 1, 32>}, {pipeline_mode = #tpu.pipeline_mode<synchronous>, transform_indices = @transform_20, window_bounds = array<i64: 32, 10>}, {pipeline_mode = #tpu.pipeline_mode<synchronous>, transform_indices = @transform_21, window_bounds = array<i64: 64, 10>}, {pipeline_mode = #tpu.pipeline_mode<synchronous>, transform_indices = @transform_22, window_bounds = array<i64: 1, 10>}, {transform_indices = @transform_23, window_bounds = array<i64: 1, 1, 10>}, {transform_indices = @transform_24, window_bounds = array<i64: 1, 1, 32>}, {transform_indices = @transform_25, window_bounds = array<i64: 1, 1, 128>}]} {
    %c0 = arith.constant 0 : index
    %c0_0 = arith.constant 0 : index
    %c0_1 = arith.constant 0 : index
    %0 = vector.load %arg1[%c0, %c0_0, %c0_1] : memref<1x1x16xf32, #tpu.memory_space<vmem>>, vector<1x1x16xf32>
    %1 = vector.shape_cast %0 : vector<1x1x16xf32> to vector<1x16xf32>
    %c0_2 = arith.constant 0 : index
    %c0_3 = arith.constant 0 : index
    %c0_4 = arith.constant 0 : index
    %2 = vector.load %arg2[%c0_2, %c0_3, %c0_4] : memref<1x1x32xf32, #tpu.memory_space<vmem>>, vector<1x1x32xf32>
    %3 = vector.shape_cast %2 : vector<1x1x32xf32> to vector<1x32xf32>
    %c0_5 = arith.constant 0 : index
    %c0_6 = arith.constant 0 : index
    %4 = vector.load %arg3[%c0_5, %c0_6] : memref<128x64xf32, #tpu.memory_space<vmem>>, vector<128x64xf32>
    %c0_7 = arith.constant 0 : index
    %c0_8 = arith.constant 0 : index
    %5 = vector.load %arg4[%c0_7, %c0_8] : memref<32x32xf32, #tpu.memory_space<vmem>>, vector<32x32xf32>
    %cst = arith.constant dense<0.000000e+00> : vector<1x32xf32>
    %6 = tpu.matmul %3, %5, %cst {dimension_numbers = #tpu.dot_dimension_numbers<[1], [0], [0], [1], [0, 0, 1, 1], [], []>} : vector<1x32xf32>, vector<32x32xf32>, vector<1x32xf32> -> vector<1x32xf32>
    %c0_9 = arith.constant 0 : index
    %c0_10 = arith.constant 0 : index
    %7 = vector.load %arg6[%c0_9, %c0_10] : memref<1x32xf32, #tpu.memory_space<vmem>>, vector<1x32xf32>
    %8 = arith.addf %6, %7 : vector<1x32xf32>
    %c0_11 = arith.constant 0 : index
    %c0_12 = arith.constant 0 : index
    %9 = vector.load %arg5[%c0_11, %c0_12] : memref<64x32xf32, #tpu.memory_space<vmem>>, vector<64x32xf32>
    %cst_13 = arith.constant dense<0.000000e+00> : vector<128x32xf32>
    %10 = tpu.matmul %4, %9, %cst_13 {dimension_numbers = #tpu.dot_dimension_numbers<[1], [0], [0], [1], [0, 0, 1, 1], [], []>} : vector<128x64xf32>, vector<64x32xf32>, vector<128x32xf32> -> vector<128x32xf32>
    %11 = vector.broadcast %8 : vector<1x32xf32> to vector<128x32xf32>
    %12 = arith.addf %10, %11 : vector<128x32xf32>
    %13 = math.tanh %12 : vector<128x32xf32>
    %c0_14 = arith.constant 0 : index
    %c0_15 = arith.constant 0 : index
    %14 = vector.load %arg7[%c0_14, %c0_15] : memref<1x32xf32, #tpu.memory_space<vmem>>, vector<1x32xf32>
    %cst_16 = arith.constant dense<0.000000e+00> : vector<1x128xf32>
    %15 = tpu.matmul %14, %13, %cst_16 {dimension_numbers = #tpu.dot_dimension_numbers<[1], [1], [0], [0], [0, 0, 1, 0], [], []>} : vector<1x32xf32>, vector<128x32xf32>, vector<1x128xf32> -> vector<1x128xf32>
    %16 = tpu.iota {dimensions = array<i32: 1>} : vector<1x128xi32>
    %c8_i32 = arith.constant 8 : i32
    %17 = vector.broadcast %c8_i32 : i32 to vector<1x128xi32>
    %18 = arith.cmpi slt, %16, %17 : vector<1x128xi32>
    %cst_17 = arith.constant -1.000000e+30 : f32
    %19 = vector.broadcast %cst_17 : f32 to vector<1x128xf32>
    %20 = arith.select %18, %15, %19 : vector<1x128xi1>, vector<1x128xf32>
    %cst_18 = arith.constant dense<0xFF800000> : vector<1xf32>
    %21 = vector.multi_reduction <maximumf>, %20, %cst_18 [1] : vector<1x128xf32> to vector<1xf32>
    %22 = vector.shape_cast %21 : vector<1xf32> to vector<1x1xf32>
    %23 = vector.broadcast %22 : vector<1x1xf32> to vector<1x128xf32>
    %24 = arith.subf %20, %23 : vector<1x128xf32>
    %25 = math.exp %24 : vector<1x128xf32>
    %cst_19 = arith.constant dense<0.000000e+00> : vector<1xf32>
    %26 = vector.multi_reduction <add>, %25, %cst_19 [1] : vector<1x128xf32> to vector<1xf32>
    %27 = vector.shape_cast %26 : vector<1xf32> to vector<1x1xf32>
    %28 = tpu.reciprocal %27 {approx = true} : vector<1x1xf32> -> vector<1x1xf32>
    %29 = vector.broadcast %28 : vector<1x1xf32> to vector<1x128xf32>
    %30 = arith.mulf %25, %29 : vector<1x128xf32>
    %c0_20 = arith.constant 0 : index
    %c0_21 = arith.constant 0 : index
    %c0_22 = arith.constant 0 : index
    %31 = vector.load %arg26[%c0_20, %c0_21, %c0_22] : memref<1x1x128xf32, #tpu.memory_space<vmem>>, vector<1x1x128xf32>
    %32 = vector.shape_cast %31 : vector<1x1x128xf32> to vector<1x128xf32>
    %33 = vector.shape_cast %30 : vector<1x128xf32> to vector<1x1x128xf32>
    tpu.vector_store %arg26[%c0_20, %c0_21, %c0_22], %33 {strides = array<i32>} : memref<1x1x128xf32, #tpu.memory_space<vmem>>, vector<1x1x128xf32>,
    %cst_23 = arith.constant dense<0.000000e+00> : vector<1x64xf32>
    %34 = tpu.matmul %30, %4, %cst_23 {dimension_numbers = #tpu.dot_dimension_numbers<[1], [0], [0], [1], [0, 0, 1, 1], [], []>} : vector<1x128xf32>, vector<128x64xf32>, vector<1x64xf32> -> vector<1x64xf32>
    %c0_24 = arith.constant 0 : index
    %c0_25 = arith.constant 0 : index
    %35 = vector.load %arg8[%c0_24, %c0_25] : memref<16x32xf32, #tpu.memory_space<vmem>>, vector<16x32xf32>
    %cst_26 = arith.constant dense<0.000000e+00> : vector<1x32xf32>
    %36 = tpu.matmul %1, %35, %cst_26 {dimension_numbers = #tpu.dot_dimension_numbers<[1], [0], [0], [1], [0, 0, 1, 1], [], []>} : vector<1x16xf32>, vector<16x32xf32>, vector<1x32xf32> -> vector<1x32xf32>
    %c0_27 = arith.constant 0 : index
    %c0_28 = arith.constant 0 : index
    %37 = vector.load %arg9[%c0_27, %c0_28] : memref<64x32xf32, #tpu.memory_space<vmem>>, vector<64x32xf32>
    %cst_29 = arith.constant dense<0.000000e+00> : vector<1x32xf32>
    %38 = tpu.matmul %34, %37, %cst_29 {dimension_numbers = #tpu.dot_dimension_numbers<[1], [0], [0], [1], [0, 0, 1, 1], [], []>} : vector<1x64xf32>, vector<64x32xf32>, vector<1x32xf32> -> vector<1x32xf32>
    %39 = arith.addf %36, %38 : vector<1x32xf32>
    %c0_30 = arith.constant 0 : index
    %c0_31 = arith.constant 0 : index
    %40 = vector.load %arg14[%c0_30, %c0_31] : memref<32x32xf32, #tpu.memory_space<vmem>>, vector<32x32xf32>
    %cst_32 = arith.constant dense<0.000000e+00> : vector<1x32xf32>
    %41 = tpu.matmul %3, %40, %cst_32 {dimension_numbers = #tpu.dot_dimension_numbers<[1], [0], [0], [1], [0, 0, 1, 1], [], []>} : vector<1x32xf32>, vector<32x32xf32>, vector<1x32xf32> -> vector<1x32xf32>
    %42 = arith.addf %39, %41 : vector<1x32xf32>
    %c0_33 = arith.constant 0 : index
    %c0_34 = arith.constant 0 : index
    %43 = vector.load %arg17[%c0_33, %c0_34] : memref<1x32xf32, #tpu.memory_space<vmem>>, vector<1x32xf32>
    %44 = arith.addf %42, %43 : vector<1x32xf32>
    %45 = arith.negf %44 : vector<1x32xf32>
    %46 = math.exp %45 : vector<1x32xf32>
    %cst_35 = arith.constant 1.000000e+00 : f32
    %47 = vector.broadcast %cst_35 : f32 to vector<1x32xf32>
    %48 = arith.addf %47, %46 : vector<1x32xf32>
    %49 = arith.divf %47, %48 : vector<1x32xf32>
    %c0_36 = arith.constant 0 : index
    %c0_37 = arith.constant 0 : index
    %50 = vector.load %arg10[%c0_36, %c0_37] : memref<16x32xf32, #tpu.memory_space<vmem>>, vector<16x32xf32>
    %cst_38 = arith.constant dense<0.000000e+00> : vector<1x32xf32>
    %51 = tpu.matmul %1, %50, %cst_38 {dimension_numbers = #tpu.dot_dimension_numbers<[1], [0], [0], [1], [0, 0, 1, 1], [], []>} : vector<1x16xf32>, vector<16x32xf32>, vector<1x32xf32> -> vector<1x32xf32>
    %c0_39 = arith.constant 0 : index
    %c0_40 = arith.constant 0 : index
    %52 = vector.load %arg11[%c0_39, %c0_40] : memref<64x32xf32, #tpu.memory_space<vmem>>, vector<64x32xf32>
    %cst_41 = arith.constant dense<0.000000e+00> : vector<1x32xf32>
    %53 = tpu.matmul %34, %52, %cst_41 {dimension_numbers = #tpu.dot_dimension_numbers<[1], [0], [0], [1], [0, 0, 1, 1], [], []>} : vector<1x64xf32>, vector<64x32xf32>, vector<1x32xf32> -> vector<1x32xf32>
    %54 = arith.addf %51, %53 : vector<1x32xf32>
    %c0_42 = arith.constant 0 : index
    %c0_43 = arith.constant 0 : index
    %55 = vector.load %arg15[%c0_42, %c0_43] : memref<32x32xf32, #tpu.memory_space<vmem>>, vector<32x32xf32>
    %cst_44 = arith.constant dense<0.000000e+00> : vector<1x32xf32>
    %56 = tpu.matmul %3, %55, %cst_44 {dimension_numbers = #tpu.dot_dimension_numbers<[1], [0], [0], [1], [0, 0, 1, 1], [], []>} : vector<1x32xf32>, vector<32x32xf32>, vector<1x32xf32> -> vector<1x32xf32>
    %57 = arith.addf %54, %56 : vector<1x32xf32>
    %c0_45 = arith.constant 0 : index
    %c0_46 = arith.constant 0 : index
    %58 = vector.load %arg18[%c0_45, %c0_46] : memref<1x32xf32, #tpu.memory_space<vmem>>, vector<1x32xf32>
    %59 = arith.addf %57, %58 : vector<1x32xf32>
    %60 = arith.negf %59 : vector<1x32xf32>
    %61 = math.exp %60 : vector<1x32xf32>
    %cst_47 = arith.constant 1.000000e+00 : f32
    %62 = vector.broadcast %cst_47 : f32 to vector<1x32xf32>
    %63 = arith.addf %62, %61 : vector<1x32xf32>
    %64 = arith.divf %62, %63 : vector<1x32xf32>
    %c0_48 = arith.constant 0 : index
    %c0_49 = arith.constant 0 : index
    %65 = vector.load %arg12[%c0_48, %c0_49] : memref<16x32xf32, #tpu.memory_space<vmem>>, vector<16x32xf32>
    %cst_50 = arith.constant dense<0.000000e+00> : vector<1x32xf32>
    %66 = tpu.matmul %1, %65, %cst_50 {dimension_numbers = #tpu.dot_dimension_numbers<[1], [0], [0], [1], [0, 0, 1, 1], [], []>} : vector<1x16xf32>, vector<16x32xf32>, vector<1x32xf32> -> vector<1x32xf32>
    %c0_51 = arith.constant 0 : index
    %c0_52 = arith.constant 0 : index
    %67 = vector.load %arg13[%c0_51, %c0_52] : memref<64x32xf32, #tpu.memory_space<vmem>>, vector<64x32xf32>
    %cst_53 = arith.constant dense<0.000000e+00> : vector<1x32xf32>
    %68 = tpu.matmul %34, %67, %cst_53 {dimension_numbers = #tpu.dot_dimension_numbers<[1], [0], [0], [1], [0, 0, 1, 1], [], []>} : vector<1x64xf32>, vector<64x32xf32>, vector<1x32xf32> -> vector<1x32xf32>
    %69 = arith.addf %66, %68 : vector<1x32xf32>
    %c0_54 = arith.constant 0 : index
    %c0_55 = arith.constant 0 : index
    %70 = vector.load %arg19[%c0_54, %c0_55] : memref<1x32xf32, #tpu.memory_space<vmem>>, vector<1x32xf32>
    %71 = arith.addf %69, %70 : vector<1x32xf32>
    %c0_56 = arith.constant 0 : index
    %c0_57 = arith.constant 0 : index
    %72 = vector.load %arg16[%c0_56, %c0_57] : memref<32x32xf32, #tpu.memory_space<vmem>>, vector<32x32xf32>
    %cst_58 = arith.constant dense<0.000000e+00> : vector<1x32xf32>
    %73 = tpu.matmul %3, %72, %cst_58 {dimension_numbers = #tpu.dot_dimension_numbers<[1], [0], [0], [1], [0, 0, 1, 1], [], []>} : vector<1x32xf32>, vector<32x32xf32>, vector<1x32xf32> -> vector<1x32xf32>
    %c0_59 = arith.constant 0 : index
    %c0_60 = arith.constant 0 : index
    %74 = vector.load %arg20[%c0_59, %c0_60] : memref<1x32xf32, #tpu.memory_space<vmem>>, vector<1x32xf32>
    %75 = arith.addf %73, %74 : vector<1x32xf32>
    %76 = arith.mulf %49, %75 : vector<1x32xf32>
    %77 = arith.addf %71, %76 : vector<1x32xf32>
    %78 = math.tanh %77 : vector<1x32xf32>
    %cst_61 = arith.constant 1.000000e+00 : f32
    %79 = vector.broadcast %cst_61 : f32 to vector<1x32xf32>
    %80 = arith.subf %79, %64 : vector<1x32xf32>
    %81 = arith.mulf %80, %78 : vector<1x32xf32>
    %82 = arith.mulf %64, %3 : vector<1x32xf32>
    %83 = arith.addf %81, %82 : vector<1x32xf32>
    %c0_62 = arith.constant 0 : index
    %c0_63 = arith.constant 0 : index
    %c0_64 = arith.constant 0 : index
    %84 = vector.load %arg25[%c0_62, %c0_63, %c0_64] : memref<1x1x32xf32, #tpu.memory_space<vmem>>, vector<1x1x32xf32>
    %85 = vector.shape_cast %84 : vector<1x1x32xf32> to vector<1x32xf32>
    %86 = vector.shape_cast %83 : vector<1x32xf32> to vector<1x1x32xf32>
    tpu.vector_store %arg25[%c0_62, %c0_63, %c0_64], %86 {strides = array<i32>} : memref<1x1x32xf32, #tpu.memory_space<vmem>>, vector<1x1x32xf32>,
    %c0_65 = arith.constant 0 : index
    %c0_66 = arith.constant 0 : index
    %87 = vector.load %arg21[%c0_65, %c0_66] : memref<32x10xf32, #tpu.memory_space<vmem>>, vector<32x10xf32>
    %cst_67 = arith.constant dense<0.000000e+00> : vector<1x10xf32>
    %88 = tpu.matmul %83, %87, %cst_67 {dimension_numbers = #tpu.dot_dimension_numbers<[1], [0], [0], [1], [0, 0, 1, 1], [], []>} : vector<1x32xf32>, vector<32x10xf32>, vector<1x10xf32> -> vector<1x10xf32>
    %c0_68 = arith.constant 0 : index
    %c0_69 = arith.constant 0 : index
    %89 = vector.load %arg22[%c0_68, %c0_69] : memref<64x10xf32, #tpu.memory_space<vmem>>, vector<64x10xf32>
    %cst_70 = arith.constant dense<0.000000e+00> : vector<1x10xf32>
    %90 = tpu.matmul %34, %89, %cst_70 {dimension_numbers = #tpu.dot_dimension_numbers<[1], [0], [0], [1], [0, 0, 1, 1], [], []>} : vector<1x64xf32>, vector<64x10xf32>, vector<1x10xf32> -> vector<1x10xf32>
    %91 = arith.addf %88, %90 : vector<1x10xf32>
    %c0_71 = arith.constant 0 : index
    %c0_72 = arith.constant 0 : index
    %92 = vector.load %arg23[%c0_71, %c0_72] : memref<1x10xf32, #tpu.memory_space<vmem>>, vector<1x10xf32>
    %93 = arith.addf %91, %92 : vector<1x10xf32>
    %c0_73 = arith.constant 0 : index
    %c0_74 = arith.constant 0 : index
    %c0_75 = arith.constant 0 : index
    %94 = vector.load %arg24[%c0_73, %c0_74, %c0_75] : memref<1x1x10xf32, #tpu.memory_space<vmem>>, vector<1x1x10xf32>
    %95 = vector.shape_cast %94 : vector<1x1x10xf32> to vector<1x10xf32>
    %96 = vector.shape_cast %93 : vector<1x10xf32> to vector<1x1x10xf32>
    tpu.vector_store %arg24[%c0_73, %c0_74, %c0_75], %96 {strides = array<i32>} : memref<1x1x10xf32, #tpu.memory_space<vmem>>, vector<1x1x10xf32>,
    return
  }
  func.func @transform_0(%arg0: i32) -> (i32, i32, i32) {
    %c0_i32 = arith.constant 0 : i32
    %c0_i32_0 = arith.constant 0 : i32
    %c0_i32_1 = arith.constant 0 : i32
    return %arg0, %c0_i32, %c0_i32_0 : i32, i32, i32
  }
  func.func @transform_1(%arg0: i32) -> (i32, i32, i32) {
    %c0_i32 = arith.constant 0 : i32
    %c0_i32_0 = arith.constant 0 : i32
    %c0_i32_1 = arith.constant 0 : i32
    return %arg0, %c0_i32, %c0_i32_0 : i32, i32, i32
  }
  func.func @transform_2(%arg0: i32) -> (i32, i32) {
    %c0_i32 = arith.constant 0 : i32
    %c0_i32_0 = arith.constant 0 : i32
    return %arg0, %c0_i32 : i32, i32
  }
  func.func @transform_3(%arg0: i32) -> (i32, i32) {
    %c0_i32 = arith.constant 0 : i32
    %c0_i32_0 = arith.constant 0 : i32
    %c0_i32_1 = arith.constant 0 : i32
    return %c0_i32, %c0_i32_0 : i32, i32
  }
  func.func @transform_4(%arg0: i32) -> (i32, i32) {
    %c0_i32 = arith.constant 0 : i32
    %c0_i32_0 = arith.constant 0 : i32
    %c0_i32_1 = arith.constant 0 : i32
    return %c0_i32, %c0_i32_0 : i32, i32
  }
  func.func @transform_5(%arg0: i32) -> (i32, i32) {
    %c0_i32 = arith.constant 0 : i32
    %c0_i32_0 = arith.constant 0 : i32
    %c0_i32_1 = arith.constant 0 : i32
    return %c0_i32, %c0_i32_0 : i32, i32
  }
  func.func @transform_6(%arg0: i32) -> (i32, i32) {
    %c0_i32 = arith.constant 0 : i32
    %c0_i32_0 = arith.constant 0 : i32
    %c0_i32_1 = arith.constant 0 : i32
    return %c0_i32, %c0_i32_0 : i32, i32
  }
  func.func @transform_7(%arg0: i32) -> (i32, i32) {
    %c0_i32 = arith.constant 0 : i32
    %c0_i32_0 = arith.constant 0 : i32
    %c0_i32_1 = arith.constant 0 : i32
    return %c0_i32, %c0_i32_0 : i32, i32
  }
  func.func @transform_8(%arg0: i32) -> (i32, i32) {
    %c0_i32 = arith.constant 0 : i32
    %c0_i32_0 = arith.constant 0 : i32
    %c0_i32_1 = arith.constant 0 : i32
    return %c0_i32, %c0_i32_0 : i32, i32
  }
  func.func @transform_9(%arg0: i32) -> (i32, i32) {
    %c0_i32 = arith.constant 0 : i32
    %c0_i32_0 = arith.constant 0 : i32
    %c0_i32_1 = arith.constant 0 : i32
    return %c0_i32, %c0_i32_0 : i32, i32
  }
  func.func @transform_10(%arg0: i32) -> (i32, i32) {
    %c0_i32 = arith.constant 0 : i32
    %c0_i32_0 = arith.constant 0 : i32
    %c0_i32_1 = arith.constant 0 : i32
    return %c0_i32, %c0_i32_0 : i32, i32
  }
  func.func @transform_11(%arg0: i32) -> (i32, i32) {
    %c0_i32 = arith.constant 0 : i32
    %c0_i32_0 = arith.constant 0 : i32
    %c0_i32_1 = arith.constant 0 : i32
    return %c0_i32, %c0_i32_0 : i32, i32
  }
  func.func @transform_12(%arg0: i32) -> (i32, i32) {
    %c0_i32 = arith.constant 0 : i32
    %c0_i32_0 = arith.constant 0 : i32
    %c0_i32_1 = arith.constant 0 : i32
    return %c0_i32, %c0_i32_0 : i32, i32
  }
  func.func @transform_13(%arg0: i32) -> (i32, i32) {
    %c0_i32 = arith.constant 0 : i32
    %c0_i32_0 = arith.constant 0 : i32
    %c0_i32_1 = arith.constant 0 : i32
    return %c0_i32, %c0_i32_0 : i32, i32
  }
  func.func @transform_14(%arg0: i32) -> (i32, i32) {
    %c0_i32 = arith.constant 0 : i32
    %c0_i32_0 = arith.constant 0 : i32
    %c0_i32_1 = arith.constant 0 : i32
    return %c0_i32, %c0_i32_0 : i32, i32
  }
  func.func @transform_15(%arg0: i32) -> (i32, i32) {
    %c0_i32 = arith.constant 0 : i32
    %c0_i32_0 = arith.constant 0 : i32
    %c0_i32_1 = arith.constant 0 : i32
    return %c0_i32, %c0_i32_0 : i32, i32
  }
  func.func @transform_16(%arg0: i32) -> (i32, i32) {
    %c0_i32 = arith.constant 0 : i32
    %c0_i32_0 = arith.constant 0 : i32
    %c0_i32_1 = arith.constant 0 : i32
    return %c0_i32, %c0_i32_0 : i32, i32
  }
  func.func @transform_17(%arg0: i32) -> (i32, i32) {
    %c0_i32 = arith.constant 0 : i32
    %c0_i32_0 = arith.constant 0 : i32
    %c0_i32_1 = arith.constant 0 : i32
    return %c0_i32, %c0_i32_0 : i32, i32
  }
  func.func @transform_18(%arg0: i32) -> (i32, i32) {
    %c0_i32 = arith.constant 0 : i32
    %c0_i32_0 = arith.constant 0 : i32
    %c0_i32_1 = arith.constant 0 : i32
    return %c0_i32, %c0_i32_0 : i32, i32
  }
  func.func @transform_19(%arg0: i32) -> (i32, i32) {
    %c0_i32 = arith.constant 0 : i32
    %c0_i32_0 = arith.constant 0 : i32
    %c0_i32_1 = arith.constant 0 : i32
    return %c0_i32, %c0_i32_0 : i32, i32
  }
  func.func @transform_20(%arg0: i32) -> (i32, i32) {
    %c0_i32 = arith.constant 0 : i32
    %c0_i32_0 = arith.constant 0 : i32
    %c0_i32_1 = arith.constant 0 : i32
    return %c0_i32, %c0_i32_0 : i32, i32
  }
  func.func @transform_21(%arg0: i32) -> (i32, i32) {
    %c0_i32 = arith.constant 0 : i32
    %c0_i32_0 = arith.constant 0 : i32
    %c0_i32_1 = arith.constant 0 : i32
    return %c0_i32, %c0_i32_0 : i32, i32
  }
  func.func @transform_22(%arg0: i32) -> (i32, i32) {
    %c0_i32 = arith.constant 0 : i32
    %c0_i32_0 = arith.constant 0 : i32
    %c0_i32_1 = arith.constant 0 : i32
    return %c0_i32, %c0_i32_0 : i32, i32
  }
  func.func @transform_23(%arg0: i32) -> (i32, i32, i32) {
    %c0_i32 = arith.constant 0 : i32
    %c0_i32_0 = arith.constant 0 : i32
    %c0_i32_1 = arith.constant 0 : i32
    return %arg0, %c0_i32, %c0_i32_0 : i32, i32, i32
  }
  func.func @transform_24(%arg0: i32) -> (i32, i32, i32) {
    %c0_i32 = arith.constant 0 : i32
    %c0_i32_0 = arith.constant 0 : i32
    %c0_i32_1 = arith.constant 0 : i32
    return %arg0, %c0_i32, %c0_i32_0 : i32, i32, i32
  }
  func.func @transform_25(%arg0: i32) -> (i32, i32, i32) {
    %c0_i32 = arith.constant 0 : i32
    %c0_i32_0 = arith.constant 0 : i32
    %c0_i32_1 = arith.constant 0 : i32
    return %arg0, %c0_i32, %c0_i32_0 : i32, i32, i32
  }
}

</mosaic_0001>

<bundles_post_ra>
// kernel: tpu_custom_call.1
= control target key start
LH: loop header
LB: loop body
LE: loop exit
PB: predicated region body
PF: predicated region fallthrough
CT: control target
= control target key end

     0   :  { %s3785_s0 = inlined_call_operand.vmem [shape: f32[2,1,16], index: 0, kind: input, shape index: {}]   ;;  %s3786_s1 = inlined_call_operand.vmem [shape: f32[2,1,32], index: 1, kind: input, shape index: {}]   ;;  %s3787_s2 = inlined_call_operand.vmem [shape: f32[256,64], index: 2, kind: input, shape index: {}]   ;;  %s3788_s3 = inlined_call_operand.vmem [shape: f32[32,32], index: 3, kind: input, shape index: {}]   ;;  %s3789_s4 = inlined_call_operand.vmem [shape: f32[64,32], index: 4, kind: input, shape index: {}]   ;;  %s3790_s5 = inlined_call_operand.vmem [shape: f32[1,32], index: 5, kind: input, shape index: {}]   ;;  %s3791_s6 = inlined_call_operand.vmem [shape: f32[1,32], index: 6, kind: input, shape index: {}]   ;;  %s3792_s7 = inlined_call_operand.vmem [shape: f32[16,32], index: 7, kind: input, shape index: {}]   ;;  %s3793_s8 = inlined_call_operand.vmem [shape: f32[64,32], index: 8, kind: input, shape index: {}]   ;;  %s3794_s9 = inlined_call_operand.vmem [shape: f32[16,32], index: 9, kind: input, shape index: {}]   ;;  %s3795_s10 = inlined_call_operand.vmem [shape: f32[64,32], index: 10, kind: input, shape index: {}]   ;;  %s3796_s11 = inlined_call_operand.vmem [shape: f32[16,32], index: 11, kind: input, shape index: {}]   ;;  %s3797_s12 = inlined_call_operand.vmem [shape: f32[64,32], index: 12, kind: input, shape index: {}]   ;;  %s3798_s13 = inlined_call_operand.vmem [shape: f32[32,32], index: 13, kind: input, shape index: {}]   ;;  %s3799_s14 = inlined_call_operand.vmem [shape: f32[32,32], index: 14, kind: input, shape index: {}]   ;;  %s3800_s15 = inlined_call_operand.vmem [shape: f32[32,32], index: 15, kind: input, shape index: {}]   ;;  %s3801_s16 = inlined_call_operand.vmem [shape: f32[1,32], index: 16, kind: input, shape index: {}]   ;;  %s3802_s17 = inlined_call_operand.vmem [shape: f32[1,32], index: 17, kind: input, shape index: {}]   ;;  %s3803_s18 = inlined_call_operand.vmem [shape: f32[1,32], index: 18, kind: input, shape index: {}]   ;;  %s3804_s19 = inlined_call_operand.vmem [shape: f32[1,32], index: 19, kind: input, shape index: {}]   ;;  %s3805_s20 = inlined_call_operand.vmem [shape: f32[32,10], index: 20, kind: input, shape index: {}]   ;;  %s3806_s21 = inlined_call_operand.vmem [shape: f32[64,10], index: 21, kind: input, shape index: {}]   ;;  %s3807_s22 = inlined_call_operand.vmem [shape: f32[1,10], index: 22, kind: input, shape index: {}]   ;;  %s3808_s23 = inlined_call_operand.hbm [shape: f32[2,1,10], index: 23, kind: output, shape index: {0}]   ;;  %s3809_s24 = inlined_call_operand.hbm [shape: f32[2,1,32], index: 24, kind: output, shape index: {1}]   ;;  %s3810_s25 = inlined_call_operand.hbm [shape: f32[2,1,128], index: 25, kind: output, shape index: {2}]  }
   0x1   :  { %3829 = sst [smem:[#allocation15_spill]] %s3785_s0 }
   0x2   :  { %3830 = sst [smem:[#allocation16_spill]] %s3786_s1 }
   0x3   :  { %3831 = sst [smem:[#allocation17_spill]] %s3787_s2 }
   0x4   :  { %3832 = sst [smem:[#allocation18_spill]] %s3788_s3 }
   0x5   :  { %3833 = sst [smem:[#allocation19_spill]] %s3789_s4 }
   0x6   :  { %3834 = sst [smem:[#allocation20_spill]] %s3790_s5 }
   0x7   :  { %3835 = sst [smem:[#allocation21_spill]] %s3791_s6 }
   0x8   :  { %3836 = sst [smem:[#allocation22_spill]] %s3792_s7 }
   0x9   :  { %3837 = sst [smem:[#allocation23_spill]] %s3793_s8 }
   0xa   :  { %3838 = sst [smem:[#allocation24_spill]] %s3794_s9 }
   0xb   :  { %3839 = sst [smem:[#allocation25_spill]] %s3795_s10 }
   0xc   :  { %3840 = sst [smem:[#allocation26_spill]] %s3796_s11 }
   0xd   :  { %3841 = sst [smem:[#allocation27_spill]] %s3797_s12 }
   0xe   :  { %3842 = sst [smem:[#allocation28_spill]] %s3807_s22 }
   0xf   :  { %3843 = sst [smem:[#allocation29_spill]] %s3808_s23 }
  0x10   :  { %3844 = sst [smem:[#allocation30_spill]] %s3810_s25 }
  0x11   :  { %31 = vsyncpa [#allocation3], 0 }
  0x12   :  { %33 = vsyncpa [#allocation3 + $0x1], 0 }
  0x13   :  { %34 = vsyncpa [#allocation5], 0 }
  0x14   :  { %36 = vsyncpa [#allocation5 + $0x1], 0  ;;  %s3175_s29 = smov 0   ;;  %s3177_s2 = smov 0  }
  0x15   :  { %s3179_s6 = smov 0   ;;  %s3181_s30 = smov 0  }
  0x16 LB: > { %3845 = sst [smem:[#allocation9_spill]] %s3026_s29  ;;  %s3196_s7 = sadd.s32 4294967295, %s3038_s30   ;;  %s3038_s30 = sphi %s3181_s30, %s3876_s30   ;;  %s3034_s6 = sphi %s3179_s6, %s3878_s6   ;;  %s3030_s2 = sphi %s3177_s2, %s3880_s2   ;;  %s3026_s29 = sphi %s3175_s29, %s3879_s29  }
  0x17   : > { %3846 = sst [smem:[#allocation10_spill]] %s3034_s6  ;;  %s3816_s3 = sadd.s32 4294967294, %s3038_s30  }
  0x18   : > { %3847 = sst [smem:[#allocation11_spill]] %s3038_s30  ;;  %s3200_s26 = sadd.s32 1, %s3038_s30  }
  0x19   : > { %3848 = sst [smem:[#allocation12_spill]] %s3200_s26  ;;  %s547_s1 = sadd.s32 1, %s3034_s6 }
  0x1a   : > { %s544_s8 = ssub.s32 %s3038_s30, %s3200_s26  ;;  %p557_p0 = scmp.ne.s32.totalorder %s3034_s6, %s3030_s2 }
  0x1b   : > { %p545_p1 = scmp.eq.s32.totalorder %s544_s8, 0  ;;  %p558_p2 = scmp.eq.s32.totalorder %s3196_s7, 1 }
  0x1c   : > { %p563_p3 = scmp.ne.s32.totalorder %s3030_s2, %s3026_s29  ;;  %p564_p4 = scmp.eq.s32.totalorder %s3816_s3, 1 }
  0x1d   : > { %s3213_s27 = scalar_select %p545_p1, %s3034_s6, %s547_s1  }
  0x1e   : > { %p3215_p5 = por %p558_p2, %p557_p0  ;;  %p3219_p6 = por %p564_p4, %p563_p3 }
  0x1f   : > { %3849 = sst [smem:[#allocation13_spill]] %s3213_s27  ;;  %p2380_p7 = scmp.ge.s32.totalorder %s3038_s30, 1 }
  0x20   : > { %s3851_s28 = scalar_select %p3219_p6, 1, 0 }
  0x21   : > { %p715_p8 = scmp.lt.s32.totalorder %s3038_s30, 3 }
  0x22   : > { %3852 = sst [smem:[#allocation14_spill]] %s3851_s28 }
  0x23   : > { %p716_p9 = pnand %p2380_p7, %p715_p8 }
  0x24   : > { %s3853_s0 = sld [smem:[#allocation19_spill]] (!%p716_p9)  ;;  %p796_p10 = scmp.lt.s32.totalorder (!%p716_p9), %s3196_s7, 1 }
  0x25   : > { %719 = sbr.rel (%p716_p9) target bundleno = 1532 (0x5fc), region = 112  ;;  %s3854_s6 = sld [smem:[#allocation18_spill]] (!%p716_p9) }
  0x26   : > { %s3240_s9 = sshll.u32 (!%p716_p9), %s3196_s7, 4  ;;  %s3856_s1 = sld [smem:[#allocation16_spill]] (!%p716_p9) }
  0x27   : > { %p803_p11 = scmp.lt.s32.totalorder (!%p716_p9), %s3240_s9, 31  ;;  %s3857_s5 = sld [smem:[#allocation17_spill]] (!%p716_p9) }
  0x28   : > { %s3858_s28 = sld [smem:[#allocation20_spill]] (!%p716_p9) }
  0x29   : > { %s3860_s10 = sld [smem:[#allocation25_spill]] (!%p716_p9) }
  0x2a   : > { %v912_v0 = vld [vmem:[%s3853_s0 + $0x38] sm:$0xff]  ;;  %v911_v1 = vld [vmem:[%s3853_s0 + $0x30] sm:$0xff]  ;;  %v3040_v2 = vmov 0.0   ;;  %v910_v5 = vld [vmem:[%s3853_s0 + $0x28] sm:$0xff]  ;;  %s3246_s8 = scalar_select %p796_p10, %s3196_s7, 1  ;;  %vm831_vm0 = vcmask 261120   ;;  %v913_v40 = vlaneseq }
  0x2b   : > { %2574 = vmatprep.subr.mxu1 %v912_v0  ;;  %2563 = vmatprep.subr.mxu0 %v3040_v2  ;;  %s3855_s26 = smov %s3854_s6  ;;  %v829_v3 = vld [vmem:[%s3854_s6 + $0x18] sm:$0xff]  ;;  %v909_v7 = vld [vmem:[%s3853_s0 + $0x20] sm:$0xff]  ;;  %v907_v11 = vld [vmem:[%s3853_s0 + $0x10] sm:$0xff]  ;;  %vm917_vm1 = vcmask 523264   ;;  %vm3041_vm2 = vmmov 0   ;;  %vm1253_vm4 = vcmask 1040384  }
  0x2c   : > { %v828_v4 = vld [vmem:[%s3855_s26 + $0x10] sm:$0xff]  ;;  %2575 = vmatpush3.msra.mxu1 %v912_v0  ;;  %2564 = vmatpush3.msra.mxu0 %v829_v3  ;;  %v827_v6 = vld [vmem:[%s3855_s26 + $0x8] sm:$0xff]  ;;  %s801_s30 = scalar_lea.vmem %s3856_s1, %s3246_s8  ;;  %v826_v8 = vld [vmem:[%s3855_s26] sm:$0xff]  ;;  %v914_v43 = vshrl.u32 %v913_v40, 7  ;;  %s3861_s22 = sld [smem:[#allocation23_spill]]  ;;  %vm1419_vm5 = vcmask 130048  }
  0x2d   : > { %2576 = vmatprep.subr.mxu1 %v911_v1  ;;  %2565 = vmatprep.subr.mxu0 %v3040_v2  ;;  %s804_s6 = scalar_select %p803_p11, %s3240_s9, 31  ;;  %v908_v9 = vld [vmem:[%s3853_s0 + $0x18] sm:$0xff]  ;;  %v3269_v10 = vld [vmem:[%s801_s30] sm:$0x1]  ;;  %v906_v13 = vld [vmem:[%s3853_s0 + $0x8] sm:$0xff]  ;;  %vm2043_vm6 = vcmask 253952  }
  0x2e   : > { %2577 = vmatpush3.msra.mxu1 %v911_v1  ;;  %2566 = vmatpush3.msra.mxu0 %v828_v4  ;;  %v905_v14 = vld [vmem:[%s3853_s0] sm:$0xff]  ;;  %v915_v48 = vsub.s32 0, %v914_v43  ;;  %s3862_s23 = sld [smem:[#allocation22_spill]] }
  0x2f   : > { %2578 = vmatprep.subr.mxu1 %v910_v5  ;;  %2567 = vmatprep.subr.mxu0 %v3040_v2  ;;  %s2382_s29 = sshll.u32 %s804_s6, 3  ;;  %v830_v44 = vld [vmem:[%s3858_s28] sm:$0x1]  ;;  %s3863_s12 = sld [smem:[#allocation27_spill]] }
  0x30   : > { %2579 = vmatpush3.msra.mxu1 %v910_v5  ;;  %2568 = vmatpush3.msra.mxu0 %v827_v6  ;;  %s3277_s1 = scalar_lea.vmem %s3857_s5, %s2382_s29  ;;  %s3859_s5 = sld [smem:[#allocation21_spill]] }
  0x31   : > { %2580 = vmatprep.subr.mxu1 %v909_v7  ;;  %2569 = vmatprep.subr.mxu0 %v3040_v2  ;;  %v3282_v12 = vld [vmem:[%s3277_s1] sm:$0xff]  ;;  %v811_v15 = vld [vmem:[%s3277_s1 + $0x8] sm:$0xff]  ;;  %v812_v16 = vld [vmem:[%s3277_s1 + $0x10] sm:$0xff]  ;;  %s3453_s29 = sand.u32 1, %s3030_s2   ;;  %s3864_s6 = sld [smem:[#allocation15_spill]] }
  0x32   : > { %2581 = vmatpush3.msra.mxu1 %v909_v7  ;;  %2570 = vmatpush3.msra.mxu0 %v826_v8  ;;  %v825_v17 = vld [vmem:[%s3277_s1 + $0x78] sm:$0xff]  ;;  %v814_v19 = vld [vmem:[%s3277_s1 + $0x20] sm:$0xff]  ;;  %v824_v20 = vld [vmem:[%s3277_s1 + $0x70] sm:$0xff]  ;;  %s3867_s11 = sld [smem:[#allocation26_spill]]  ;;  %s789_s30 = scalar_lea.vmem [#allocation4], %s3453_s29 }
  0x33   : > { %2582 = vmatprep.subr.mxu1 %v908_v9  ;;  %2571 = vmatprep.mubr.msk.f32.mxu0 %vm3041_vm2, %v3040_v2  ;;  %v813_v18 = vld [vmem:[%s3277_s1 + $0x18] sm:$0xff]  ;;  %v823_v21 = vld [vmem:[%s3277_s1 + $0x68] sm:$0xff]  ;;  %v816_v23 = vld [vmem:[%s3277_s1 + $0x30] sm:$0xff] }
  0x34   : > { %2583 = vmatpush3.msra.mxu1 %v908_v9  ;;  %2572 = vmatmul.mubr.msk.f32.vlgmr.msra.gmra.mxu0 %vm831_vm0, %v3269_v10  ;;  %v815_v22 = vld [vmem:[%s3277_s1 + $0x28] sm:$0xff]  ;;  %v822_v24 = vld [vmem:[%s3277_s1 + $0x60] sm:$0xff]  ;;  %v821_v25 = vld [vmem:[%s3277_s1 + $0x58] sm:$0xff] }
  0x35   : > { %2584 = vmatprep.subr.mxu1 %v907_v11  ;;  %2590 = vmatprep.mubr.msk.f32.mxu1 %vm917_vm1, %v3282_v12  ;;  %v817_v26 = vld [vmem:[%s3277_s1 + $0x38] sm:$0xff]  ;;  %v818_v27 = vld [vmem:[%s3277_s1 + $0x40] sm:$0xff]  ;;  %v820_v28 = vld [vmem:[%s3277_s1 + $0x50] sm:$0xff] }
  0x36   : > { %2585 = vmatpush3.msra.mxu1 %v907_v11  ;;  %2614 = vmatprep.subr.mxu0 %v3040_v2  ;;  %v819_v29 = vld [vmem:[%s3277_s1 + $0x48] sm:$0xff]  ;;  %s3826_s1 = scalar_lea.vmem [#allocation6], %s3453_s29 }
  0x37   : > { %2586 = vmatprep.subr.mxu1 %v906_v13  ;;  %2646 = vmatprep.mubr.msk.f32.mxu0 %vm3041_vm2, %v3040_v2  ;;  %s798_s3 = scalar_lea.vmem %s3864_s6, %s3246_s8  ;;  %s3865_s6 = sld [smem:[#allocation24_spill]] }
  0x38   : > { %2587 = vmatpush3.msra.mxu1 %v906_v13  ;;  %s2236_s8 = scalar_lea.hbm %s3809_s24, %s3240_s9 }
  0x39   : > { %2588 = vmatprep.subr.mxu1 %v905_v14 }
  0x3a   : > { %2589 = vmatpush3.msra.mxu1 %v905_v14 }
  0x3b   : > { %2591 = vmatmul.mubr.msk.f32.vlgmr.msra.gmra.mxu1 %vm917_vm1, %v811_v15  ;;  %2649 = vmatprep.subr.mxu1 %v3040_v2 }
  0x3c   : > { %2593 = vmatprep.mubr.msk.f32.mxu1 %vm917_vm1, %v812_v16  ;;  %2650 = vmatpush3.msra.mxu1 %v825_v17 }
  0x3d   : > { %2651 = vmatprep.subr.mxu1 %v3040_v2 }
  0x3e   : > { %2652 = vmatpush3.msra.mxu1 %v824_v20 }
  0x3f   : > { %2594 = vmatmul.mubr.msk.f32.gmra.mxu1 %vm917_vm1, %v813_v18  ;;  %2653 = vmatprep.subr.mxu1 %v3040_v2 }
  0x40   : > { %2596 = vmatprep.mubr.msk.f32.mxu1 %vm917_vm1, %v814_v19  ;;  %2654 = vmatpush3.msra.mxu1 %v823_v21 }
  0x41   : > { %2655 = vmatprep.subr.mxu1 %v3040_v2 }
  0x42   : > { %2656 = vmatpush3.msra.mxu1 %v822_v24 }
  0x43   : > { %2597 = vmatmul.mubr.msk.f32.gmra.mxu1 %vm917_vm1, %v815_v22  ;;  %2657 = vmatprep.subr.mxu1 %v3040_v2 }
  0x44   : > { %2599 = vmatprep.mubr.msk.f32.mxu1 %vm917_vm1, %v816_v23  ;;  %2658 = vmatpush3.msra.mxu1 %v821_v25 }
  0x45   : > { %2659 = vmatprep.subr.mxu1 %v3040_v2 }
  0x46   : > { %2660 = vmatpush3.msra.mxu1 %v820_v28 }
  0x47   : > { %2600 = vmatmul.mubr.msk.f32.gmra.mxu1 %vm917_vm1, %v817_v26  ;;  %2661 = vmatprep.subr.mxu1 %v3040_v2 }
  0x48   : > { %2602 = vmatprep.mubr.msk.f32.mxu1 %vm917_vm1, %v818_v27  ;;  %2662 = vmatpush3.msra.mxu1 %v819_v29 }
  0x49   : > { %2663 = vmatprep.subr.mxu1 %v3040_v2 }
  0x4a   : > { %2664 = vmatpush3.msra.mxu1 %v818_v27 }
  0x4b   : > { %2603 = vmatmul.mubr.msk.f32.gmra.mxu1 %vm917_vm1, %v819_v29  ;;  %2665 = vmatprep.subr.mxu1 %v3040_v2 }
  0x4c   : > { %2605 = vmatprep.mubr.msk.f32.mxu1 %vm917_vm1, %v820_v28  ;;  %2666 = vmatpush3.msra.mxu1 %v817_v26 }
  0x4d   : > { %2667 = vmatprep.subr.mxu1 %v3040_v2 }
  0x4e   : > { %2668 = vmatpush3.msra.mxu1 %v816_v23 }
  0x4f   : > { %2606 = vmatmul.mubr.msk.f32.gmra.mxu1 %vm917_vm1, %v821_v25  ;;  %2669 = vmatprep.subr.mxu1 %v3040_v2  ;;  %v1250_v25 = vand.u32 127, %v913_v40  ;;  %v1580_v40 = vld [vmem:[%s3860_s10 + $0x10] sm:$0xff] }
  0x50   : > { %2608 = vmatprep.mubr.msk.f32.mxu1 %vm917_vm1, %v822_v24  ;;  %2670 = vmatpush3.msra.mxu1 %v815_v22  ;;  %v1127_v24 = vld [vmem:[%s3859_s5] sm:$0x1]  ;;  %s3042_s5 = smov [#allocation4]  }
  0x51   : > { %2671 = vmatprep.subr.mxu1 %v3040_v2  ;;  %vm1251_vm3 = vcmp.lt.s32.totalorder %v1250_v25, 8  ;;  %v2052_v25 = vld [vmem:[%s3806_s21 + $0x18] sm:$0xff]  ;;  %s2926_s25 = sshll.u32 %s3042_s5, 4  ;;  %s2927_s25 = int_to_ptr.vmem [resolvable:$false] %s2926_s25 }
  0x52   : > { %2672 = vmatpush3.msra.mxu1 %v814_v19 }
  0x53   : > { %2609 = vmatmul.mubr.msk.f32.gmra.mxu1 %vm917_vm1, %v823_v21  ;;  %2673 = vmatprep.subr.mxu1 %v3040_v2 }
  0x54   : > { %2611 = vmatprep.mubr.msk.f32.mxu1 %vm917_vm1, %v824_v20  ;;  %2674 = vmatpush3.msra.mxu1 %v813_v18 }
  0x55   : > { %2675 = vmatprep.subr.mxu1 %v3040_v2 }
  0x56   : > { %2676 = vmatpush3.msra.mxu1 %v812_v16 }
  0x57   : > { %2612 = vmatmul.mubr.msk.f32.gmra.mxu1 %vm917_vm1, %v825_v17  ;;  %2677 = vmatprep.subr.mxu1 %v3040_v2 }
  0x58   : > { %2678 = vmatpush3.msra.mxu1 %v811_v15  ;;  %2681 = vmatprep.mubr.msk.f32.mxu1 %vm3041_vm2, %v3040_v2 }
  0x59   : > { %2679 = vmatprep.subr.mxu1 %v3040_v2 }
  0x5a   : > { %2680 = vmatpush3.msra.mxu1 %v3282_v12 }
  0x5b   : > { %2684 = vmatprep.subr.mxu1 %v3040_v2 }
  0xf4   : > { %v901_v30 = vpop.f32.mrf.mxu0 }
  0xf5   : > { %v902_v47 = vadd.f32 %v901_v30, %v830_v44 }
  0xf6   : > { %v2573_v31 = vpop.f32.mrf.mxu0 }
  0xf7   : > { %v3359_v51 = vrot.slane %v902_v47, %v915_v48  ;;  %v1344_v47 = vld [vmem:[%s3861_s22 + $0x30] sm:$0xff]  ;;  %v1343_v48 = vld [vmem:[%s3861_s22 + $0x28] sm:$0xff] }
  0xfb   : > { %v3347_v32 = vpop.f32.mrf.mxu1 }
  0xfc   : > { %v1038_v16 = vadd.f32 %v3347_v32, %v3359_v51 }
  0xfd   : > { %v3349_v33 = vpop.f32.mrf.mxu1 }
  0xfe   : > { %v1033_v18 = vadd.f32 %v3349_v33, %v3359_v51 }
  0xff   : > { %v3351_v34 = vpop.f32.mrf.mxu1 }
 0x100   : > { %v1048_v12 = vadd.f32 %v3351_v34, %v3359_v51 }
 0x101   : > { %v3353_v35 = vpop.f32.mrf.mxu1 }
 0x102   : > { %v1043_v14 = vadd.f32 %v3353_v35, %v3359_v51  ;;  %v1585_v35 = vld [vmem:[%s3860_s10 + $0x38] sm:$0xff] }
 0x103   : > { %v2598_v36 = vpop.f32.mrf.mxu1 }
 0x104   : > { %v1058_v7 = vadd.f32 %v2598_v36, %v3359_v51  ;;  %v1584_v36 = vld [vmem:[%s3860_s10 + $0x30] sm:$0xff] }
 0x105   : > { %v1052_v37 = vpop.f32.mrf.mxu1 }
 0x106   : > { %v1053_v9 = vadd.f32 %v1052_v37, %v3359_v51  ;;  %v1583_v37 = vld [vmem:[%s3860_s10 + $0x28] sm:$0xff] }
 0x107   : > { %v2601_v38 = vpop.f32.mrf.mxu1 }
 0x108   : > { %v1068_v3 = vadd.f32 %v2601_v38, %v3359_v51  ;;  %v1582_v38 = vld [vmem:[%s3860_s10 + $0x20] sm:$0xff] }
 0x109   : > { %v1062_v39 = vpop.f32.mrf.mxu1 }
 0x10a   : > { %v1063_v5 = vadd.f32 %v1062_v39, %v3359_v51  ;;  %v1581_v39 = vld [vmem:[%s3860_s10 + $0x18] sm:$0xff] }
 0x10b   : > { %v2604_v41 = vpop.f32.mrf.mxu1 }
 0x10c   : > { %v1078_v62 = vadd.f32 %v2604_v41, %v3359_v51  ;;  %v1579_v41 = vld [vmem:[%s3860_s10 + $0x8] sm:$0xff] }
 0x10d   : > { %v1072_v42 = vpop.f32.mrf.mxu1 }
 0x10e   : > { %v1073_v0 = vadd.f32 %v1072_v42, %v3359_v51  ;;  %v1578_v42 = vld [vmem:[%s3860_s10] sm:$0xff] }
 0x10f   : > { %v2607_v45 = vpop.f32.mrf.mxu1 }
 0x110   : > { %v1088_v58 = vadd.f32 %v2607_v45, %v3359_v51 }
 0x111   : > { %v1082_v46 = vpop.f32.mrf.mxu1 }
 0x112   : > { %v1083_v60 = vadd.f32 %v1082_v46, %v3359_v51  ;;  %v1345_v46 = vld [vmem:[%s3861_s22 + $0x38] sm:$0xff] }
 0x113   : > { %v2610_v49 = vpop.f32.mrf.mxu1 }
 0x114   : > { %v1098_v56 = vadd.f32 %v2610_v49, %v3359_v51  ;;  %v1342_v49 = vld [vmem:[%s3861_s22 + $0x20] sm:$0xff] }
 0x115   : > { %v1092_v50 = vpop.f32.mrf.mxu1 }
 0x116   : > { %v1093_v57 = vadd.f32 %v1092_v50, %v3359_v51  ;;  %v1341_v50 = vld [vmem:[%s3861_s22 + $0x18] sm:$0xff] }
 0x117   : > { %v2613_v52 = vpop.f32.mrf.mxu1 }
 0x118   : > { %v1108_v53 = vadd.f32 %v2613_v52, %v3359_v51  ;;  %v1339_v52 = vld [vmem:[%s3861_s22 + $0x8] sm:$0xff] }
 0x119   : > { %v1102_v54 = vpop.f32.mrf.mxu1 }
 0x11a   : > { %2876 = vtanh.f32 %v1108_v53  ;;  %v1103_v55 = vadd.f32 %v1102_v54, %v3359_v51  ;;  %v1340_v51 = vld [vmem:[%s3861_s22 + $0x10] sm:$0xff]  ;;  %v1338_v53 = vld [vmem:[%s3861_s22] sm:$0xff]  ;;  %v1337_v54 = vld [vmem:[%s3862_s23 + $0x8] sm:$0xff] }
 0x11c   : > { %2878 = vtanh.f32 %v1103_v55  ;;  %v1818_v55 = vld [vmem:[%s3863_s12 + $0x38] sm:$0xff] }
 0x11d   : > { %2880 = vtanh.f32 %v1098_v56 }
 0x11e   : > { %2882 = vtanh.f32 %v1093_v57  ;;  %v1336_v57 = vld [vmem:[%s3862_s23] sm:$0xff] }
 0x11f   : > { %2884 = vtanh.f32 %v1088_v58  ;;  %v1817_v58 = vld [vmem:[%s3863_s12 + $0x30] sm:$0xff] }
 0x120   : > { %2886 = vtanh.f32 %v1083_v60  ;;  %v3516_v60 = vld [vmem:[%s798_s3] sm:$0x1]  ;;  %s3866_s3 = smov %s3865_s6 }
 0x121   : > { %2888 = vtanh.f32 %v1078_v62  ;;  %v1816_v62 = vld [vmem:[%s3863_s12 + $0x28] sm:$0xff] }
 0x122   : > { %2890 = vtanh.f32 %v1073_v0  ;;  %v1815_v0 = vld [vmem:[%s3863_s12 + $0x20] sm:$0xff] }
 0x123   : > { %2892 = vtanh.f32 %v1068_v3  ;;  %v1814_v3 = vld [vmem:[%s3863_s12 + $0x18] sm:$0xff] }
 0x124   : > { %2894 = vtanh.f32 %v1063_v5  ;;  %v1813_v5 = vld [vmem:[%s3863_s12 + $0x10] sm:$0xff] }
 0x125   : > { %2896 = vtanh.f32 %v1058_v7  ;;  %v1812_v7 = vld [vmem:[%s3863_s12 + $0x8] sm:$0xff] }
 0x126   : > { %2898 = vtanh.f32 %v1053_v9  ;;  %v1811_v9 = vld [vmem:[%s3863_s12] sm:$0xff] }
 0x127   : > { %v2877_v59 = vpop.eup %2876  ;;  %2900 = vtanh.f32 %v1048_v12  ;;  %v1728_v12 = vld [vmem:[%s3799_s14 + $0x10] sm:$0xff] }
 0x128   : > { %2615 = vmatpush3.xpose.msk.msra.mxu0 %vm831_vm0, %v2877_v59  ;;  %2902 = vtanh.f32 %v1043_v14  ;;  %v1726_v14 = vld [vmem:[%s3799_s14] sm:$0xff] }
 0x129   : > { %2616 = vmatprep.subr.mxu0 %v3040_v2  ;;  %v2879_v61 = vpop.eup %2878  ;;  %2904 = vtanh.f32 %v1038_v16  ;;  %v1809_v16 = vld [vmem:[%s3867_s11] sm:$0xff] }
 0x12a   : > { %v2881_v63 = vpop.eup %2880  ;;  %2906 = vtanh.f32 %v1033_v18  ;;  %v1963_v18 = vld [vmem:[%s3800_s15 + $0x10] sm:$0xff] }
 0x12b   : > { %v2883_v1 = vpop.eup %2882 }
 0x12c   : > { %2617 = vmatpush3.xpose.msk.msra.mxu0 %vm831_vm0, %v2879_v61  ;;  %v2885_v4 = vpop.eup %2884  ;;  %v1496_v61 = vld [vmem:[%s3798_s13 + $0x18] sm:$0xff] }
 0x12d   : > { %2618 = vmatprep.subr.mxu0 %v3040_v2  ;;  %v2887_v6 = vpop.eup %2886 }
 0x12e   : > { %v2889_v8 = vpop.eup %2888 }
 0x12f   : > { %v2891_v11 = vpop.eup %2890 }
 0x130   : > { %2619 = vmatpush3.xpose.msk.msra.mxu0 %vm831_vm0, %v2881_v63  ;;  %v2893_v13 = vpop.eup %2892  ;;  %v1495_v63 = vld [vmem:[%s3798_s13 + $0x10] sm:$0xff] }
 0x131   : > { %2620 = vmatprep.subr.mxu0 %v3040_v2  ;;  %v2895_v15 = vpop.eup %2894 }
 0x132   : > { %v2897_v17 = vpop.eup %2896 }
 0x133   : > { %v2899_v19 = vpop.eup %2898 }
 0x134   : > { %2621 = vmatpush3.xpose.msk.msra.mxu0 %vm831_vm0, %v2883_v1  ;;  %v2901_v20 = vpop.eup %2900  ;;  %v1494_v1 = vld [vmem:[%s3798_s13 + $0x8] sm:$0xff] }
 0x135   : > { %2622 = vmatprep.subr.mxu0 %v3040_v2  ;;  %v2903_v21 = vpop.eup %2902 }
 0x136   : > { %v2905_v22 = vpop.eup %2904 }
 0x137   : > { %v2907_v23 = vpop.eup %2906 }
 0x138   : > { %2623 = vmatpush3.xpose.msk.msra.mxu0 %vm831_vm0, %v2885_v4  ;;  %v1493_v4 = vld [vmem:[%s3798_s13] sm:$0xff] }
 0x139   : > { %2624 = vmatprep.subr.mxu0 %v3040_v2 }
 0x13c   : > { %2625 = vmatpush3.xpose.msk.msra.mxu0 %vm831_vm0, %v2887_v6  ;;  %v1577_v6 = vld [vmem:[%s3865_s6 + $0x8] sm:$0xff]  ;;  %s2208_s6 = sand.u32 1, %s3196_s7  }
 0x13d   : > { %2626 = vmatprep.subr.mxu0 %v3040_v2  ;;  %s3710_s10 = scalar_lea.sflag [#allocation5], %s2208_s6 }
 0x140   : > { %2627 = vmatpush3.xpose.msk.msra.mxu0 %vm831_vm0, %v2889_v8  ;;  %v1576_v8 = vld [vmem:[%s3866_s3] sm:$0xff]  ;;  %s2928_s3 = scalar_lea.vmem %s2927_s25, 32 }
 0x141   : > { %2628 = vmatprep.subr.mxu0 %v3040_v2 }
 0x144   : > { %2629 = vmatpush3.xpose.msk.msra.mxu0 %vm831_vm0, %v2891_v11  ;;  %v1729_v11 = vld [vmem:[%s3799_s14 + $0x18] sm:$0xff] }
 0x145   : > { %2630 = vmatprep.subr.mxu0 %v3040_v2 }
 0x148   : > { %2631 = vmatpush3.xpose.msk.msra.mxu0 %vm831_vm0, %v2893_v13  ;;  %v1727_v13 = vld [vmem:[%s3799_s14 + $0x8] sm:$0xff] }
 0x149   : > { %2632 = vmatprep.subr.mxu0 %v3040_v2 }
 0x14c   : > { %2633 = vmatpush3.xpose.msk.msra.mxu0 %vm831_vm0, %v2895_v15  ;;  %v1810_v15 = vld [vmem:[%s3867_s11 + $0x8] sm:$0xff] }
 0x14d   : > { %2634 = vmatprep.subr.mxu0 %v3040_v2 }
 0x150   : > { %2635 = vmatpush3.xpose.msk.msra.mxu0 %vm831_vm0, %v2897_v17  ;;  %v1964_v17 = vld [vmem:[%s3800_s15 + $0x18] sm:$0xff] }
 0x151   : > { %2636 = vmatprep.subr.mxu0 %v3040_v2 }
 0x154   : > { %2637 = vmatpush3.xpose.msk.msra.mxu0 %vm831_vm0, %v2899_v19  ;;  %v1962_v19 = vld [vmem:[%s3800_s15 + $0x8] sm:$0xff] }
 0x155   : > { %2638 = vmatprep.subr.mxu0 %v3040_v2 }
 0x158   : > { %2639 = vmatpush3.xpose.msk.msra.mxu0 %vm831_vm0, %v2901_v20  ;;  %v1961_v20 = vld [vmem:[%s3800_s15] sm:$0xff] }
 0x159   : > { %2640 = vmatprep.subr.mxu0 %v3040_v2 }
 0x15c   : > { %2641 = vmatpush3.xpose.msk.msra.mxu0 %vm831_vm0, %v2903_v21  ;;  %v2056_v21 = vld [vmem:[%s3806_s21 + $0x38] sm:$0xff] }
 0x15d   : > { %2642 = vmatprep.subr.mxu0 %v3040_v2 }
 0x160   : > { %2643 = vmatpush3.xpose.msk.msra.mxu0 %vm831_vm0, %v2905_v22  ;;  %v2055_v22 = vld [vmem:[%s3806_s21 + $0x30] sm:$0xff] }
 0x161   : > { %2644 = vmatprep.subr.mxu0 %v3040_v2 }
 0x164   : > { %2645 = vmatpush3.xpose.msk.msra.mxu0 %vm831_vm0, %v2907_v23  ;;  %v2054_v23 = vld [vmem:[%s3806_s21 + $0x28] sm:$0xff] }
 0x165   : > { %2721 = vmatprep.subr.mxu0 %v3040_v2 }
 0x167   : > { %2647 = vmatmul.mubr.msk.f32.vlgmr.msra.gmra.mxu0 %vm831_vm0, %v1127_v24  ;;  %v2053_v24 = vld [vmem:[%s3806_s21 + $0x20] sm:$0xff] }
 0x168   : > { %2737 = vmatprep.mubr.msk.f32.mxu0 %vm3041_vm2, %v3040_v2  ;;  %2722 = vmatpush3.msra.mxu0 %v1585_v35 }
 0x169   : > { %2723 = vmatprep.subr.mxu0 %v3040_v2 }
 0x16a   : > { %2724 = vmatpush3.msra.mxu0 %v1584_v36 }
 0x16b   : > { %2725 = vmatprep.subr.mxu0 %v3040_v2 }
 0x16c   : > { %2726 = vmatpush3.msra.mxu0 %v1583_v37 }
 0x16d   : > { %2727 = vmatprep.subr.mxu0 %v3040_v2 }
 0x16e   : > { %2728 = vmatpush3.msra.mxu0 %v1582_v38 }
 0x16f   : > { %2729 = vmatprep.subr.mxu0 %v3040_v2 }
 0x170   : > { %2730 = vmatpush3.msra.mxu0 %v1581_v39 }
 0x171   : > { %2731 = vmatprep.subr.mxu0 %v3040_v2 }
 0x172   : > { %2732 = vmatpush3.msra.mxu0 %v1580_v40 }
 0x173   : > { %2733 = vmatprep.subr.mxu0 %v3040_v2 }
 0x174   : > { %2734 = vmatpush3.msra.mxu0 %v1579_v41  ;;  %v1568_v41 = vld [vmem:[%s3801_s16] sm:$0x1] }
 0x175   : > { %2735 = vmatprep.subr.mxu0 %v3040_v2 }
 0x176   : > { %2736 = vmatpush3.msra.mxu0 %v1578_v42 }
 0x177   : > { %2758 = vmatprep.subr.mxu0 %v3040_v2 }
 0x227   : > { %v1245_v26 = vpop.f32.mrf.mxu0 }
 0x228   : > { %v1252_v27 = vsel %vm1251_vm3, %v1245_v26, -1e+30  ;;  %v2051_v26 = vld [vmem:[%s3806_s21 + $0x10] sm:$0xff] }
 0x229   : > { %v2648_v28 = vpop.f32.mrf.mxu0  ;;  %v1254_v29 = vsel %vm1253_vm4, %v1252_v27, -inf }
 0x22a   : > { %1255 = vmax.xlane.f32.xlu0 %v1254_v29  ;;  %v2049_v28 = vld [vmem:[%s3806_s21] sm:$0xff]  ;;  %v2048_v29 = vld [vmem:[%s3805_s20 + $0x18] sm:$0xff] }
 0x2b3   : > { %v1256_v30 = vpop.xlane.xlu0 %1255 }
 0x2b4   : > { %v1257_v31 = vsub.f32 %v1252_v27, %v1256_v30  ;;  %v2050_v27 = vld [vmem:[%s3806_s21 + $0x8] sm:$0xff]  ;;  %v2047_v30 = vld [vmem:[%s3805_s20 + $0x10] sm:$0xff] }
 0x2b6   : > { %v1258_v32 = vmul.f32 1.442695, %v1257_v31  ;;  %v2046_v31 = vld [vmem:[%s3805_s20 + $0x8] sm:$0xff] }
 0x2b8   : > { %2908 = vpow2.f32 %v1258_v32  ;;  %v2045_v32 = vld [vmem:[%s3805_s20] sm:$0xff] }
 0x2c5   : > { %v2909_v33 = vpop.eup %2908 }
 0x2c6   : > { %v1260_v34 = vsel %vm1253_vm4, %v2909_v33, 0.0 }
 0x2c7   : > { %1261 = vadd.xlane.f32.xlu0 %v1260_v34 }
 0x350   : > { %v1262_v43 = vpop.xlane.xlu0 %1261 }
 0x351   : > { %2910 = vrcp.f32 %v1262_v43 }
 0x35e   : > { %v2911_v44 = vpop.eup %2910 }
 0x35f   : > { %v1264_v45 = vmul.f32 %v2911_v44, %v2909_v33 }
 0x361   : > { %2682 = vmatmul.mubr.f32.vlgmr.msra.gmra.mxu1 %v1264_v45  ;;  %1265 = vst [vmem:[%s3826_s1] sm:$0x1] %v1264_v45  ;;  %s2238_s1 = sshll.u32 %s789_s30, 4  ;;  %s2239_s1 = int_to_ptr.vmem [resolvable:$true] %s2238_s1 }
 0x362   : > { %2685 = vmatpush3.msra.mxu1 %v1345_v46  ;;  %2700 = vmatprep.mubr.msk.f32.mxu1 %vm3041_vm2, %v3040_v2  ;;  %s2922_s0 = scalar_lea.vmem %s2239_s1, 16  ;;  %p2929_p1 = scmp.lt.s32.totalorder %s2239_s1, %s2927_s25 }
 0x363   : > { %2686 = vmatprep.subr.mxu1 %v3040_v2  ;;  %p2923_p12 = scmp.ne.s32.totalorder %s2239_s1, %s2922_s0  ;;  %p2930_p2 = scmp.lt.s32.totalorder %s2928_s3, %s2922_s0 }
 0x364   : > { %2687 = vmatpush3.msra.mxu1 %v1344_v47 }
 0x365   : > { %2688 = vmatprep.subr.mxu1 %v3040_v2  ;;  %p2924_p13 = pnand %p2923_p12, %p3215_p5  ;;  %p2931_p3 = por %p2930_p2, %p2929_p1 }
 0x366   : > { %2689 = vmatpush3.msra.mxu1 %v1343_v48 }
 0x367   : > { %2690 = vmatprep.subr.mxu1 %v3040_v2  ;;  %p2925_p0 = pneg %p2924_p13 }
 0x368   : > { %2691 = vmatpush3.msra.mxu1 %v1342_v49 }
 0x369   : > { %2692 = vmatprep.subr.mxu1 %v3040_v2  ;;  %p2932_p4 = pnand %p2931_p3, %p2925_p0 }
 0x36a   : > { %2693 = vmatpush3.msra.mxu1 %v1341_v50 }
 0x36b   : > { %2694 = vmatprep.subr.mxu1 %v3040_v2 }
 0x36c   : > { %2695 = vmatpush3.msra.mxu1 %v1340_v51  ;;  %v1801_v51 = vld [vmem:[%s3802_s17] sm:$0x1] }
 0x36d   : > { %2696 = vmatprep.subr.mxu1 %v3040_v2 }
 0x36e   : > { %2697 = vmatpush3.msra.mxu1 %v1339_v52 }
 0x36f   : > { %2698 = vmatprep.subr.mxu1 %v3040_v2 }
 0x370   : > { %2699 = vmatpush3.msra.mxu1 %v1338_v53 }
 0x371   : > { %2703 = vmatprep.subr.mxu1 %v3040_v2 }
 0x421   : > { %v3498_v56 = vpop.f32.mrf.mxu1 }
 0x422   : > { %2701 = vmatmul.mubr.msk.f32.vlgmr.msra.gmra.mxu1 %vm917_vm1, %v3498_v56  ;;  %2738 = vmatmul.mubr.msk.f32.vlgmr.msra.gmra.mxu0 %vm917_vm1, %v3498_v56 }
 0x423   : > { %2704 = vmatpush3.msra.mxu1 %v1337_v54  ;;  %2759 = vmatpush3.msra.mxu0 %v1818_v55  ;;  %v2683_v59 = vpop.f32.mrf.mxu1 }
 0x424   : > { %2705 = vmatprep.subr.mxu1 %v3040_v2  ;;  %2760 = vmatprep.subr.mxu0 %v3040_v2 }
 0x425   : > { %2706 = vmatpush3.msra.mxu1 %v1336_v57  ;;  %2761 = vmatpush3.msra.mxu0 %v1817_v58 }
 0x426   : > { %2707 = vmatprep.mubr.msk.f32.mxu1 %vm3041_vm2, %v3040_v2  ;;  %2710 = vmatprep.subr.mxu1 %v3040_v2 }
 0x427   : > { %2762 = vmatprep.subr.mxu0 %v3040_v2  ;;  %2708 = vmatmul.mubr.msk.f32.vlgmr.msra.gmra.mxu1 %vm1419_vm5, %v3516_v60 }
 0x428   : > { %2711 = vmatpush3.msra.mxu1 %v1496_v61  ;;  %2763 = vmatpush3.msra.mxu0 %v1816_v62  ;;  %v1965_v62 = vld [vmem:[%s3804_s19] sm:$0x1] }
 0x429   : > { %2712 = vmatprep.subr.mxu1 %v3040_v2  ;;  %2764 = vmatprep.subr.mxu0 %v3040_v2 }
 0x42a   : > { %2713 = vmatpush3.msra.mxu1 %v1495_v63  ;;  %2765 = vmatpush3.msra.mxu0 %v1815_v0 }
 0x42b   : > { %2714 = vmatprep.subr.mxu1 %v3040_v2  ;;  %2766 = vmatprep.subr.mxu0 %v3040_v2 }
 0x42c   : > { %2715 = vmatpush3.msra.mxu1 %v1494_v1  ;;  %2767 = vmatpush3.msra.mxu0 %v1814_v3  ;;  %v1959_v3 = vld [vmem:[%s3803_s18] sm:$0x1] }
 0x42d   : > { %2716 = vmatprep.subr.mxu1 %v3040_v2  ;;  %2768 = vmatprep.subr.mxu0 %v3040_v2 }
 0x42e   : > { %2717 = vmatpush3.msra.mxu1 %v1493_v4  ;;  %2718 = vmatprep.mubr.msk.f32.mxu1 %vm3041_vm2, %v3040_v2 }
 0x42f   : > { %2769 = vmatpush3.msra.mxu0 %v1813_v5  ;;  %2719 = vmatmul.mubr.msk.f32.vlgmr.msra.gmra.mxu1 %vm831_vm0, %v3269_v10 }
 0x430   : > { %2740 = vmatprep.subr.mxu1 %v3040_v2  ;;  %2770 = vmatprep.subr.mxu0 %v3040_v2 }
 0x431   : > { %2741 = vmatpush3.msra.mxu1 %v1577_v6  ;;  %2771 = vmatpush3.msra.mxu0 %v1812_v7 }
 0x432   : > { %2742 = vmatprep.subr.mxu1 %v3040_v2  ;;  %2772 = vmatprep.subr.mxu0 %v3040_v2 }
 0x433   : > { %2743 = vmatpush3.msra.mxu1 %v1576_v8  ;;  %2744 = vmatprep.mubr.msk.f32.mxu1 %vm3041_vm2, %v3040_v2 }
 0x434   : > { %2773 = vmatpush3.msra.mxu0 %v1811_v9  ;;  %2774 = vmatprep.mubr.msk.f32.mxu0 %vm3041_vm2, %v3040_v2 }
 0x435   : > { %2745 = vmatmul.mubr.msk.f32.vlgmr.msra.gmra.mxu1 %vm1419_vm5, %v3516_v60  ;;  %2747 = vmatprep.subr.mxu1 %v3040_v2 }
 0x436   : > { %2775 = vmatmul.mubr.msk.f32.vlgmr.msra.gmra.mxu0 %vm917_vm1, %v3498_v56  ;;  %2748 = vmatpush3.msra.mxu1 %v1729_v11 }
 0x437   : > { %2749 = vmatprep.subr.mxu1 %v3040_v2  ;;  %2755 = vmatprep.mubr.msk.f32.mxu1 %vm3041_vm2, %v3040_v2 }
 0x438   : > { %2750 = vmatpush3.msra.mxu1 %v1728_v12  ;;  %2814 = vmatprep.subr.mxu0 %v3040_v2 }
 0x439   : > { %2751 = vmatprep.subr.mxu1 %v3040_v2  ;;  %2822 = vmatprep.mubr.msk.f32.mxu0 %vm3041_vm2, %v3040_v2 }
 0x43a   : > { %2752 = vmatpush3.msra.mxu1 %v1727_v13  ;;  %2815 = vmatpush3.msra.mxu0 %v2048_v29 }
 0x43b   : > { %2753 = vmatprep.subr.mxu1 %v3040_v2  ;;  %2816 = vmatprep.subr.mxu0 %v3040_v2 }
 0x43c   : > { %2754 = vmatpush3.msra.mxu1 %v1726_v14  ;;  %2817 = vmatpush3.msra.mxu0 %v2047_v30 }
 0x43d   : > { %2756 = vmatmul.mubr.msk.f32.vlgmr.msra.gmra.mxu1 %vm831_vm0, %v3269_v10  ;;  %2777 = vmatprep.subr.mxu1 %v3040_v2 }
 0x43e   : > { %2778 = vmatpush3.msra.mxu1 %v1810_v15  ;;  %2781 = vmatprep.mubr.msk.f32.mxu1 %vm3041_vm2, %v3040_v2 }
 0x43f   : > { %2779 = vmatprep.subr.mxu1 %v3040_v2  ;;  %2818 = vmatprep.subr.mxu0 %v3040_v2 }
 0x440   : > { %2780 = vmatpush3.msra.mxu1 %v1809_v16  ;;  %2819 = vmatpush3.msra.mxu0 %v2046_v31 }
 0x441   : > { %2782 = vmatmul.mubr.msk.f32.vlgmr.msra.gmra.mxu1 %vm1419_vm5, %v3516_v60  ;;  %2784 = vmatprep.subr.mxu1 %v3040_v2 }
 0x442   : > { %2785 = vmatpush3.msra.mxu1 %v1964_v17  ;;  %2792 = vmatprep.mubr.msk.f32.mxu1 %vm3041_vm2, %v3040_v2 }
 0x443   : > { %2786 = vmatprep.subr.mxu1 %v3040_v2  ;;  %2820 = vmatprep.subr.mxu0 %v3040_v2 }
 0x444   : > { %2787 = vmatpush3.msra.mxu1 %v1963_v18  ;;  %2821 = vmatpush3.msra.mxu0 %v2045_v32 }
 0x445   : > { %2788 = vmatprep.subr.mxu1 %v3040_v2 }
 0x446   : > { %2789 = vmatpush3.msra.mxu1 %v1962_v19 }
 0x447   : > { %2790 = vmatprep.subr.mxu1 %v3040_v2 }
 0x448   : > { %2791 = vmatpush3.msra.mxu1 %v1961_v20 }
 0x449   : > { %2795 = vmatprep.subr.mxu1 %v3040_v2  ;;  %2793 = vmatmul.mubr.msk.f32.vlgmr.msra.gmra.mxu1 %vm831_vm0, %v3269_v10 }
 0x44a   : > { %2796 = vmatpush3.msra.mxu1 %v2056_v21  ;;  %2811 = vmatprep.mubr.msk.f32.mxu1 %vm3041_vm2, %v3040_v2 }
 0x44b   : > { %2797 = vmatprep.subr.mxu1 %v3040_v2 }
 0x44c   : > { %2798 = vmatpush3.msra.mxu1 %v2055_v22 }
 0x44d   : > { %2799 = vmatprep.subr.mxu1 %v3040_v2 }
 0x44e   : > { %2800 = vmatpush3.msra.mxu1 %v2054_v23 }
 0x44f   : > { %2801 = vmatprep.subr.mxu1 %v3040_v2 }
 0x450   : > { %2802 = vmatpush3.msra.mxu1 %v2053_v24 }
 0x451   : > { %2803 = vmatprep.subr.mxu1 %v3040_v2 }
 0x452   : > { %2804 = vmatpush3.msra.mxu1 %v2052_v25 }
 0x453   : > { %2805 = vmatprep.subr.mxu1 %v3040_v2 }
 0x454   : > { %2806 = vmatpush3.msra.mxu1 %v2051_v26 }
 0x455   : > { %2807 = vmatprep.subr.mxu1 %v3040_v2 }
 0x456   : > { %2808 = vmatpush3.msra.mxu1 %v2050_v27 }
 0x457   : > { %2809 = vmatprep.subr.mxu1 %v3040_v2 }
 0x458   : > { %2810 = vmatpush3.msra.mxu1 %v2049_v28 }
 0x459   : > { %2812 = vmatmul.mubr.msk.f32.vlgmr.msra.gmra.mxu1 %vm917_vm1, %v3498_v56 }
 0x4e2   : > { %v1415_v33 = vpop.f32.mrf.mxu1  ;;  %v1652_v34 = vpop.f32.mrf.mxu0 }
 0x4e4   : > { %v2702_v35 = vpop.f32.mrf.mxu1  ;;  %v2739_v36 = vpop.f32.mrf.mxu0 }
 0x4e7   : > { %v1489_v37 = vpop.f32.mrf.mxu1 }
 0x4e8   : > { %v1490_v39 = vadd.f32 %v1489_v37, %v1415_v33 }
 0x4e9   : > { %v2709_v38 = vpop.f32.mrf.mxu1 }
 0x4ef   : > { %v1563_v40 = vpop.f32.mrf.mxu1 }
 0x4f0   : > { %v1567_v42 = vadd.f32 %v1563_v40, %v1490_v39 }
 0x4f1   : > { %v2720_v43 = vpop.f32.mrf.mxu1 }
 0x4f2   : > { %v1569_v44 = vadd.f32 %v1568_v41, %v1567_v42 }
 0x4f4   : > { %v2420_v45 = vmul.f32 -1.442695, %v1569_v44 }
 0x4f5   : > { %v1722_v46 = vpop.f32.mrf.mxu1 }
 0x4f6   : > { %2912 = vpow2.f32 %v2420_v45  ;;  %v1885_v2 = vpop.f32.mrf.mxu0  ;;  %v1723_v49 = vadd.f32 %v1722_v46, %v1652_v34 }
 0x4f7   : > { %v2746_v47 = vpop.f32.mrf.mxu1 }
 0x4f8   : > { %v2776_v48 = vpop.f32.mrf.mxu0 }
 0x4fd   : > { %v1796_v50 = vpop.f32.mrf.mxu1 }
 0x4fe   : > { %v1800_v52 = vadd.f32 %v1796_v50, %v1723_v49 }
 0x4ff   : > { %v2757_v53 = vpop.f32.mrf.mxu1 }
 0x500   : > { %v1802_v54 = vadd.f32 %v1801_v51, %v1800_v52 }
 0x501   : > { %v1955_v55 = vpop.f32.mrf.mxu1 }
 0x502   : > { %v2424_v56 = vmul.f32 -1.442695, %v1802_v54  ;;  %v1956_v63 = vadd.f32 %v1955_v55, %v1885_v2 }
 0x503   : > { %v2913_v57 = vpop.eup %2912  ;;  %v2783_v58 = vpop.f32.mrf.mxu1 }
 0x504   : > { %v1573_v59 = vadd.f32 1.0, %v2913_v57  ;;  %2914 = vpow2.f32 %v2424_v56  ;;  %v1960_v6 = vadd.f32 %v1959_v3, %v1956_v63 }
 0x506   : > { %2916 = vrcp.f32 %v1573_v59 }
 0x509   : > { %v2032_v60 = vpop.f32.mrf.mxu1 }
 0x50a   : > { %v2033_v0 = vadd.f32 %v2032_v60, %v1965_v62 }
 0x50b   : > { %v2794_v61 = vpop.f32.mrf.mxu1 }
 0x511   : > { %v2915_v1 = vpop.eup %2914 }
 0x512   : > { %v1806_v4 = vadd.f32 1.0, %v2915_v1 }
 0x513   : > { %v2917_v5 = vpop.eup %2916 }
 0x514   : > { %2918 = vrcp.f32 %v1806_v4  ;;  %v2036_v7 = vmul.f32 %v2917_v5, %v2033_v0 }
 0x516   : > { %v2037_v8 = vadd.f32 %v2036_v7, %v1960_v6 }
 0x518   : > { %2920 = vtanh.f32 %v2037_v8 }
 0x519   : > { %v3700_v9 = vpop.f32.mrf.mxu1 }
 0x51b   : > { %v2813_v11 = vpop.f32.mrf.mxu1 }
 0x521   : > { %v2919_v12 = vpop.eup %2918 }
 0x522   : > { %v2039_v13 = vsub.f32 1.0, %v2919_v12  ;;  %v2041_v16 = vmul.f32 %v2919_v12, %v3269_v10 }
 0x525   : > { %v2921_v14 = vpop.eup %2920 }
 0x526   : > { %v2040_v15 = vmul.f32 %v2921_v14, %v2039_v13 }
 0x528   : > { %v2042_v17 = vadd.f32 %v2041_v16, %v2040_v15 }
 0x52a   : > { %2823 = vmatmul.mubr.msk.f32.vlgmr.msra.gmra.mxu0 %vm831_vm0, %v2042_v17  ;;  %2044 = vst.msk [vmem:[%s789_s30] sm:$0x1] %vm2043_vm6, %v2042_v17 }
 0x52b   : > { %2935 = shalt.err (!%p2932_p4)
}
 0x52c   : > { %s2936_s7 = scalar_lea.hbm %s2236_s8, 16  ;;  %s2940_s27 = scalar_lea.hbm %s3809_s24, 32 }
 0x52d   : > { %p2937_p7 = scmp.ne.s32.totalorder %s2236_s8, %s2936_s7  ;;  %p2941_p10 = scmp.lt.s32.totalorder %s2236_s8, %s3809_s24 }
 0x52e   : > { %p2942_p11 = scmp.lt.s32.totalorder %s2940_s27, %s2936_s7 }
 0x52f   : > { %p2938_p8 = pnand %p2937_p7, %p3215_p5 }
 0x530   : > { %p2943_p12 = por %p2942_p11, %p2941_p10 }
 0x531   : > { %p2939_p9 = pneg %p2938_p8 }
 0x533   : > { %p2944_p13 = pnand %p2943_p12, %p2939_p9 }
 0x535   : > { %2947 = shalt.err (!%p2944_p13)
}
 0x536   : > { %2826 = dma.vmem_to_hbm [thread:$0]  (%p3215_p5), %s2239_s1, 16, %s2236_s8, %s3710_s10  }
 0x537   : > { %s3868_s5 = sld [smem:[#allocation30_spill]]  ;;  %s3869_s30 = scalar_lea.vmem [#allocation6], %s3453_s29 }
 0x538   : > { %s2251_s6 = sshll.u32 %s3869_s30, 4  ;;  %s3043_s7 = smov [#allocation6]   ;;  %s2252_s6 = int_to_ptr.vmem [resolvable:$true] %s2251_s6 }
 0x539   : > { %s2948_s11 = scalar_lea.vmem %s2252_s6, 16  ;;  %s2952_s27 = sshll.u32 %s3043_s7, 4  ;;  %s2953_s27 = int_to_ptr.vmem [resolvable:$false] %s2952_s27 }
 0x53a   : > { %p2949_p0 = scmp.ne.s32.totalorder %s2252_s6, %s2948_s11  ;;  %s2954_s28 = scalar_lea.vmem %s2953_s27, 32 }
 0x53b   : > { %p2955_p3 = scmp.lt.s32.totalorder %s2252_s6, %s2953_s27  ;;  %p2956_p4 = scmp.lt.s32.totalorder %s2954_s28, %s2948_s11 }
 0x53c   : > { %p2950_p1 = pnand %p2949_p0, %p3215_p5 }
 0x53d   : > { %s2249_s25 = scalar_lea.hbm %s3868_s5, %s3240_s9  ;;  %p2957_p7 = por %p2956_p4, %p2955_p3 }
 0x53e   : > { %p2951_p2 = pneg %p2950_p1 }
 0x540   : > { %p2958_p8 = pnand %p2957_p7, %p2951_p2 }
 0x542   : > { %2961 = shalt.err (!%p2958_p8)
}
 0x543   : > { %s2962_s8 = scalar_lea.hbm %s2249_s25, 16  ;;  %s2966_s0 = scalar_lea.hbm %s3868_s5, 32 }
 0x544   : > { %p2963_p9 = scmp.ne.s32.totalorder %s2249_s25, %s2962_s8  ;;  %p2967_p12 = scmp.lt.s32.totalorder %s2249_s25, %s3868_s5 }
 0x545   : > { %p2968_p13 = scmp.lt.s32.totalorder %s2966_s0, %s2962_s8 }
 0x546   : > { %p2964_p10 = pnand %p2963_p9, %p3215_p5 }
 0x547   : > { %p2969_p0 = por %p2968_p13, %p2967_p12 }
 0x548   : > { %p2965_p11 = pneg %p2964_p10 }
 0x54a   : > { %p2970_p1 = pnand %p2969_p0, %p2965_p11 }
 0x54c   : > { %2973 = shalt.err (!%p2970_p1)
}
 0x54d   : > { %2827 = dma.vmem_to_hbm [thread:$0]  (%p3215_p5), %s2252_s6, 16, %s2249_s25, %s3710_s10   ;;  %vm2202_vm7 = vcmask 73728  }
 0x54e   : > { %s3870_s27 = sld [smem:[#allocation28_spill]]  ;;  %s783_s28 = scalar_lea.vmem [#allocation2], %s3453_s29 }
 0x54f   : > { %s2225_s12 = sshll.u32 %s783_s28, 4  ;;  %s3871_s3 = sld [smem:[#allocation29_spill]]  ;;  %s2226_s12 = int_to_ptr.vmem [resolvable:$true] %s2225_s12 }
 0x550   : > { %s2205_s30 = scalar_lea.sflag [#allocation3], %s3453_s29  ;;  %s2974_s10 = scalar_lea.vmem %s2226_s12, 16 }
 0x551   : > { %p2975_p2 = scmp.ne.s32.totalorder %s2226_s12, %s2974_s10  ;;  %s3044_s25 = smov [#allocation2]  }
 0x552   : > { %s2978_s6 = sshll.u32 %s3044_s25, 4  ;;  %s2979_s6 = int_to_ptr.vmem [resolvable:$false] %s2978_s6 }
 0x553   : > { %p2976_p3 = pnand %p2975_p2, %p3215_p5  ;;  %s2980_s11 = scalar_lea.vmem %s2979_s6, 32 }
 0x554   : > { %v2200_v18 = vld [vmem:[%s3870_s27] sm:$0x1]  ;;  %p2981_p7 = scmp.lt.s32.totalorder %s2226_s12, %s2979_s6  ;;  %p2982_p8 = scmp.lt.s32.totalorder %s2980_s11, %s2974_s10 }
 0x555   : > { %s2223_s0 = scalar_lea.hbm %s3871_s3, %s3240_s9  ;;  %p2977_p4 = pneg %p2976_p3 }
 0x556   : > { %p2983_p9 = por %p2982_p8, %p2981_p7 }
 0x558   : > { %p2984_p10 = pnand %p2983_p9, %p2977_p4 }
 0x5ea   : > { %v2196_v10 = vpop.f32.mrf.mxu0 }
 0x5eb   : > { %v2197_v19 = vadd.f32 %v2196_v10, %v3700_v9 }
 0x5ec   : > { %v2824_v20 = vpop.f32.mrf.mxu0 }
 0x5ed   : > { %v2201_v21 = vadd.f32 %v2200_v18, %v2197_v19 }
 0x5ef   : > { %2203 = vst.msk [vmem:[%s783_s28] sm:$0x1] %vm2202_vm7, %v2201_v21 }
 0x5f0   : > { %2987 = shalt.err (!%p2984_p10)
}
 0x5f1   : > { %s2988_s7 = scalar_lea.hbm %s2223_s0, 16  ;;  %s2992_s27 = scalar_lea.hbm %s3871_s3, 32 }
 0x5f2   : > { %p2989_p11 = scmp.ne.s32.totalorder %s2223_s0, %s2988_s7  ;;  %p2993_p0 = scmp.lt.s32.totalorder %s2223_s0, %s3871_s3 }
 0x5f3   : > { %p2994_p1 = scmp.lt.s32.totalorder %s2992_s27, %s2988_s7 }
 0x5f4   : > { %p2990_p12 = pnand %p2989_p11, %p3215_p5 }
 0x5f5   : > { %p2995_p2 = por %p2994_p1, %p2993_p0 }
 0x5f6   : > { %p2991_p13 = pneg %p2990_p12 }
 0x5f8   : > { %p2996_p3 = pnand %p2995_p2, %p2991_p13 }
 0x5fa   : > { %2999 = shalt.err (!%p2996_p3)
}
 0x5fb   : > { %2825 = dma.vmem_to_hbm [thread:$0]  (%p3215_p5), %s2226_s12, 16, %s2223_s0, %s2205_s30  }
 0x5fc PF: > { %s3872_s1 = sld [smem:[#allocation11_spill]] }
 0x5fd   : > { %s3873_s10 = sld [smem:[#allocation9_spill]] }
 0x602   : > { %p2841_p4 = scmp.ge.s32.totalorder %s3872_s1, 2 }
 0x603   : > { %s2263_s6 = sand.u32 1, %s3873_s10  }
 0x604   : > { %p2832_p7 = pnand %p2841_p4, %p3219_p6  ;;  %s2264_s11 = scalar_lea.sflag [#allocation3], %s2263_s6 }
 0x606   : > { %p2833_p8 = pneg %p2832_p7 }
 0x608   : > { %3017 = dma.done.wait (%p2833_p8), %s2264_s11, 16  }
 0x609   : > { %3019 = vsyncadd (%p2833_p8), %s2264_s11, 4294967280  ;;  %s3875_s7 = sadd.s32 4294967294, %s3872_s1  }
 0x60a   : > { %s2271_s9 = sand.u32 1, %s3875_s7  }
 0x60b   : > { %s2272_s29 = scalar_lea.sflag [#allocation5], %s2271_s9 }
 0x60c   : > { %3021 = dma.done.wait (%p2833_p8), %s2272_s29, 32  }
 0x60d   : > { %3023 = vsyncadd (%p2833_p8), %s2272_s29, 4294967264  ;;  %s3876_s30 = sld [smem:[#allocation12_spill]]  ;;  %s3879_s29 = smov %s3030_s2 }
 0x60e   : > { %s3877_s4 = sld [smem:[#allocation10_spill]] }
 0x60f   : > { %s3878_s6 = sld [smem:[#allocation13_spill]] }
 0x613   : > { %p39_p5 = scmp.ge.s32.totalorder %s3876_s30, 4  }
 0x614   : > { %s3880_s2 = smov %s3877_s4 }
 0x615   :  { %41 = sbr.rel (!%p39_p5) target bundleno = 22 (0x16), region = 185 }
 0x61a   :  { %2284 = vsyncpa [#allocation3], 1 }
 0x61b   :  { %2286 = vsyncpa [#allocation3 + $0x1], 1 }
 0x61c   :  { %2287 = vsyncpa [#allocation5], 1 }
 0x61d   :  { %2289 = vsyncpa [#allocation5 + $0x1], 1 }

</bundles_post_ra>
